<compile_context>
chip_gen: v6e
topology: v6e:2x2x1
jax: 0.10.0
libtpu: 0.0.40
codegen_flags: <defaults>
</compile_context>

<pallas_src>
import functools
import math

import jax
import jax.numpy as jnp
from jax.experimental import pallas as pl
from jax.experimental.pallas import tpu as pltpu

KERNEL_SIZE = 5
BN_EPS = 1e-5


def _round_up(x, m):
    return ((x + m - 1) // m) * m


# ----------------------------------------------------------------------------
# Pallas kernels
# ----------------------------------------------------------------------------
def conv_bn_relu_pool_kernel(p_ref, w_ref, gamma_ref, beta_ref, o_ref, *, eps):
    # p_ref : (Kpad, 4*Mp) bf16  im2col patches, pool-shift-major columns,
    #                            with a ones row folded in for the conv bias.
    # w_ref : (C, Kpad)    bf16  conv filters (+ bias column), zero K-padding.
    # out   : (C, Mp)      f32   BatchNorm(batch stats) + ReLU + MaxPool2d(2).
    z = jnp.dot(w_ref[...], p_ref[...], preferred_element_type=jnp.float32)  # (C, 4*Mp)
    cnt = float(z.shape[1])
    mean = jnp.sum(z, axis=1, keepdims=True) / cnt                           # (C, 1)
    # One-pass (biased) variance: E[x^2] - mean^2 (clamped for numerical safety).
    var = jnp.maximum(jnp.sum(z * z, axis=1, keepdims=True) / cnt - mean * mean, 0.0)
    y = (z - mean) * jax.lax.rsqrt(var + eps) * gamma_ref[...] + beta_ref[...]
    y = jnp.maximum(y, 0.0)                                                  # ReLU
    mp = o_ref.shape[1]
    # MaxPool2d(2): columns are (shift, n, hp, wp) -> max over the 4 shift blocks.
    o_ref[...] = jnp.maximum(jnp.maximum(y[:, :mp], y[:, mp:2 * mp]),
                             jnp.maximum(y[:, 2 * mp:3 * mp], y[:, 3 * mp:]))


def matmul_bias_kernel(x_ref, w_ref, b_ref, o_ref):
    # (M, K)bf16 @ (K, N)bf16 + (1, N)f32 -> (M, N)f32; K and N are 128-multiples.
    o_ref[...] = (jnp.dot(x_ref[...], w_ref[...], preferred_element_type=jnp.float32)
                  + b_ref[...]).astype(o_ref.dtype)


def pair_mlp_kernel(q_ref, s_ref, w1q_ref, w1s_ref, w2_ref, b2_ref, o_ref):
    # scores[i, j] = sigmoid(relu(cat(q[i], s[j]) @ W1 + b1) @ W2 + b2)
    # b1 is folded into row EMBED_DIM of w1q (picked up by the all-ones column that
    # the embed kernel writes); b2 is a scalar read from SMEM.
    a = jnp.dot(q_ref[...].astype(jnp.bfloat16), w1q_ref[...],
                preferred_element_type=jnp.float32)                 # (Nq, E)
    b = jnp.dot(s_ref[...].astype(jnp.bfloat16), w1s_ref[...],
                preferred_element_type=jnp.float32)                 # (Ns, E)
    h = jnp.maximum(a[:, None, :] + b[None, :, :], 0.0)             # (Nq, Ns, E)
    score = jnp.sum(h * w2_ref[...], axis=-1) + b2_ref[0, 0]        # (Nq, Ns)
    o_ref[...] = 1.0 / (1.0 + jnp.exp(-score))                      # Sigmoid


# ----------------------------------------------------------------------------
# pallas_call wrappers (shapes are KB-scale: whole-array VMEM blocks, no grid)
# ----------------------------------------------------------------------------
def _vmem(n):
    return [pl.BlockSpec(memory_space=pltpu.MemorySpace.VMEM) for _ in range(n)]


def conv_bn_relu_pool(patches_t, w, gamma, beta):
    c = w.shape[0]
    mp = patches_t.shape[1] // 4
    return pl.pallas_call(
        functools.partial(conv_bn_relu_pool_kernel, eps=BN_EPS),
        out_shape=jax.ShapeDtypeStruct((c, mp), jnp.float32),
        in_specs=_vmem(4),
        out_specs=pl.BlockSpec(memory_space=pltpu.MemorySpace.VMEM),
    )(patches_t, w, gamma, beta)


def matmul_bias(x, w, b):
    return pl.pallas_call(
        matmul_bias_kernel,
        out_shape=jax.ShapeDtypeStruct((x.shape[0], w.shape[1]), jnp.float32),
        in_specs=_vmem(3),
        out_specs=pl.BlockSpec(memory_space=pltpu.MemorySpace.VMEM),
    )(x, w, b)


def pair_scores(q_ext, s_ext, w1q, w1s, w2, b2):
    return pl.pallas_call(
        pair_mlp_kernel,
        out_shape=jax.ShapeDtypeStruct((q_ext.shape[0], s_ext.shape[0]), jnp.float32),
        in_specs=_vmem(5) + [pl.BlockSpec(memory_space=pltpu.MemorySpace.SMEM)],
        out_specs=pl.BlockSpec(memory_space=pltpu.MemorySpace.VMEM),
    )(q_ext, s_ext, w1q, w1s, w2, b2)


# ----------------------------------------------------------------------------
# Glue (XLA reshapes / pads only)
# ----------------------------------------------------------------------------
def im2col_pool_major_T(x, k, kpad):
    """(N, H, W, C) -> (Kpad, 4*N*(H/2)*(W/2)) bf16 transposed patch slab.

    Columns are ordered (pool_shift, n, hp, wp) so the fused kernel's 2x2 max-pool is a
    max over four contiguous column blocks.  A ones row is appended (bias folding)
    before zero-padding the contraction dim up to `kpad` (a multiple of 128).
    """
    n, h, w, c = x.shape
    pad = k // 2
    xp = jnp.pad(x, ((0, 0), (pad, pad), (pad, pad), (0, 0)))
    cols = [xp[:, kh:kh + h, kw:kw + w, :] for kh in range(k) for kw in range(k)]
    patches = jnp.stack(cols, axis=3).reshape(n, h, w, k * k * c)
    hp, wp = h // 2, w // 2
    blocks = [patches[:, i::2, j::2, :].reshape(n * hp * wp, k * k * c)
              for i in (0, 1) for j in (0, 1)]
    p = jnp.concatenate(blocks, axis=0)                              # (4*Mp, K*K*C)
    p = jnp.concatenate([p, jnp.ones((p.shape[0], 1), p.dtype)], axis=1)
    p = jnp.pad(p, ((0, 0), (0, kpad - p.shape[1])))
    return p.T.astype(jnp.bfloat16)                                  # (Kpad, 4*Mp)


# ----------------------------------------------------------------------------
# Parameters (deterministic synthetic init, shapes from the nn.Module, pre-padded)
# ----------------------------------------------------------------------------
def init_params(key, c_in, conv_channels, embed_dim, k, wh_after_conv):
    keys = jax.random.split(key, 6)
    kk = k * k
    kdims = [kk * c_in, kk * conv_channels]
    kpads = [_round_up(d + 1, 128) for d in kdims]        # +1 = folded conv-bias column
    feat = conv_channels * wh_after_conv * wh_after_conv
    fpad = _round_up(feat, 128)
    epad = _round_up(embed_dim + 1, 128)                  # +1 = ones column for b1 fold

    def normal(kk_key, shape, fan_in):
        return jax.random.normal(kk_key, shape, jnp.float32) / math.sqrt(fan_in)

    conv_w = []
    for layer in range(2):
        wmat = jnp.zeros((conv_channels, kpads[layer]), jnp.float32)
        wmat = wmat.at[:, :kdims[layer]].set(
            normal(keys[layer], (conv_channels, kdims[layer]), kdims[layer]))
        # Column kdims[layer] is the conv bias (zero-init); remaining columns are K padding.
        conv_w.append(wmat.astype(jnp.bfloat16))

    embed_w = jnp.zeros((fpad, epad), jnp.float32)
    embed_w = embed_w.at[:feat, :embed_dim].set(normal(keys[2], (feat, embed_dim), feat))
    # embed bias (zeros) + constant 1.0 at column `embed_dim` (feeds the b1 fold).
    embed_b = jnp.zeros((1, epad), jnp.float32).at[0, embed_dim].set(1.0)

    w1q = jnp.zeros((epad, embed_dim), jnp.float32)
    w1q = w1q.at[:embed_dim, :].set(normal(keys[3], (embed_dim, embed_dim), 2 * embed_dim))
    # Row `embed_dim` of w1q holds the pair layer-1 bias b1 (zero-init).
    w1s = jnp.zeros((epad, embed_dim), jnp.float32)
    w1s = w1s.at[:embed_dim, :].set(normal(keys[4], (embed_dim, embed_dim), 2 * embed_dim))

    return {
        "conv_w": conv_w,
        "bn_gamma": [jnp.ones((conv_channels, 1), jnp.float32)] * 2,
        "bn_beta": [jnp.zeros((conv_channels, 1), jnp.float32)] * 2,
        "embed_w": embed_w.astype(jnp.bfloat16),
        "embed_b": embed_b,
        "w1q": w1q.astype(jnp.bfloat16),
        "w1s": w1s.astype(jnp.bfloat16),
        "w2": normal(keys[5], (1, embed_dim), embed_dim),
        "b2": jnp.zeros((1, 1), jnp.float32),
    }


# ----------------------------------------------------------------------------
# Forward pass (mirrors RelationNetwork.forward)
# ----------------------------------------------------------------------------
def relation_network_forward(params, s_x, s_y, q_x, q_y):
    ns = s_x.shape[0]

    # Support + query share the embedding network -> embed them as one batch.
    h = jnp.concatenate([s_x, q_x], axis=0)

    for layer in range(len(params["conv_w"])):
        n, hh, ww, _ = h.shape
        w_l = params["conv_w"][layer]
        c_out, kpad = w_l.shape
        patches_t = im2col_pool_major_T(h, KERNEL_SIZE, kpad)                # glue
        pooled = conv_bn_relu_pool(patches_t, w_l,
                                   params["bn_gamma"][layer],
                                   params["bn_beta"][layer])                 # Pallas (fused)
        hp, wp = hh // 2, ww // 2
        h = jnp.transpose(pooled.reshape(c_out, n, hp, wp), (1, 2, 3, 0))    # -> NHWC

    # PyTorch .reshape(N, -1) flattens in NCHW order.
    n, hp, wp, c = h.shape
    flat = jnp.transpose(h, (0, 3, 1, 2)).reshape(n, c * hp * wp)
    fpad = params["embed_w"].shape[0]
    flat = jnp.pad(flat, ((0, 0), (0, fpad - flat.shape[1]))).astype(jnp.bfloat16)

    emb = matmul_bias(flat, params["embed_w"], params["embed_b"])            # Pallas, (N, EPAD)
    s_emb, q_emb = emb[:ns], emb[ns:]

    # pair index = q * Ns + s (q repeat_interleave, s tiled), same as PyTorch.
    scores = pair_scores(q_emb, s_emb, params["w1q"], params["w1s"],
                         params["w2"], params["b2"])                         # Pallas, (Nq, Ns)

    scores_flat = scores.reshape(-1)
    gold = (q_y[:, None] == s_y[None, :]).astype(jnp.float32).reshape(-1)
    # Reproduces nn.MSELoss broadcasting of [P,1] predictions vs [P] targets exactly
    # (the PyTorch code never squeezes pair_scores).
    loss = jnp.mean((scores_flat[:, None] - gold[None, :]) ** 2)

    pred_y = s_y[jnp.argmax(scores, axis=-1)]
    return loss, pred_y


# ----------------------------------------------------------------------------
if __name__ == "__main__":
    key = jax.random.PRNGKey(0)
    k_param, k_sx, k_qx, k_sy, k_qy = jax.random.split(key, 5)

    # shapes consistent with the module: H=W=16, 2 conv layers, pool 2 -> wh_after_conv=4
    n_support, n_query = 4, 4
    c_in, conv_channels, embed_dim = 4, 8, 32
    h = w = 16

    s_x = jax.random.normal(k_sx, (n_support, h, w, c_in), jnp.float32)
    q_x = jax.random.normal(k_qx, (n_query, h, w, c_in), jnp.float32)
    s_y = jax.random.randint(k_sy, (n_support,), 0, 3, jnp.int32)
    q_y = jax.random.randint(k_qy, (n_query,), 0, 3, jnp.int32)

    params = init_params(k_param, c_in, conv_channels, embed_dim, KERNEL_SIZE, 4)

    fwd = jax.jit(relation_network_forward)
    loss, pred_y = fwd(params, s_x, s_y, q_x, q_y)
    jax.block_until_ready((loss, pred_y))
    assert loss.shape == () and pred_y.shape == (n_query,)
    print("KERNEL_OK")
</pallas_src>

<mosaic_0001>
module attributes {stable_mosaic.version = 11 : i64} {
  func.func @conv_bn_relu_pool_kernel(%arg0: memref<128x2048xbf16, #tpu.memory_space<vmem>>, %arg1: memref<8x128xbf16, #tpu.memory_space<vmem>>, %arg2: memref<8x1xf32, #tpu.memory_space<vmem>>, %arg3: memref<8x1xf32, #tpu.memory_space<vmem>>, %arg4: memref<8x512xf32, #tpu.memory_space<vmem>>) attributes {dimension_semantics = [], scalar_prefetch = 0 : i64, scratch_operands = 0 : i64, tpu.core_type = #tpu.core_type<tc>} {
    %c0 = arith.constant 0 : index
    %c0_0 = arith.constant 0 : index
    %0 = vector.load %arg1[%c0, %c0_0] : memref<8x128xbf16, #tpu.memory_space<vmem>>, vector<8x128xbf16>
    %c0_1 = arith.constant 0 : index
    %c0_2 = arith.constant 0 : index
    %1 = vector.load %arg0[%c0_1, %c0_2] : memref<128x2048xbf16, #tpu.memory_space<vmem>>, vector<128x2048xbf16>
    %cst = arith.constant dense<0.000000e+00> : vector<8x2048xf32>
    %2 = tpu.matmul %0, %1, %cst {dimension_numbers = #tpu.dot_dimension_numbers<[1], [0], [0], [1], [0, 0, 1, 1], [], []>} : vector<8x128xbf16>, vector<128x2048xbf16>, vector<8x2048xf32> -> vector<8x2048xf32>
    %cst_3 = arith.constant dense<0.000000e+00> : vector<8xf32>
    %3 = vector.multi_reduction <add>, %2, %cst_3 [1] : vector<8x2048xf32> to vector<8xf32>
    %4 = vector.shape_cast %3 : vector<8xf32> to vector<8x1xf32>
    %cst_4 = arith.constant 2.048000e+03 : f32
    %5 = vector.broadcast %cst_4 : f32 to vector<8x1xf32>
    %6 = arith.divf %4, %5 : vector<8x1xf32>
    %7 = arith.mulf %2, %2 : vector<8x2048xf32>
    %cst_5 = arith.constant dense<0.000000e+00> : vector<8xf32>
    %8 = vector.multi_reduction <add>, %7, %cst_5 [1] : vector<8x2048xf32> to vector<8xf32>
    %9 = vector.shape_cast %8 : vector<8xf32> to vector<8x1xf32>
    %cst_6 = arith.constant 2.048000e+03 : f32
    %10 = vector.broadcast %cst_6 : f32 to vector<8x1xf32>
    %11 = arith.divf %9, %10 : vector<8x1xf32>
    %12 = arith.mulf %6, %6 : vector<8x1xf32>
    %13 = arith.subf %11, %12 : vector<8x1xf32>
    %cst_7 = arith.constant 0.000000e+00 : f32
    %14 = vector.broadcast %cst_7 : f32 to vector<8x1xf32>
    %15 = arith.maximumf %13, %14 : vector<8x1xf32>
    %16 = vector.broadcast %6 : vector<8x1xf32> to vector<8x2048xf32>
    %17 = arith.subf %2, %16 : vector<8x2048xf32>
    %cst_8 = arith.constant 9.99999974E-6 : f32
    %18 = vector.broadcast %cst_8 : f32 to vector<8x1xf32>
    %19 = arith.addf %15, %18 : vector<8x1xf32>
    %20 = math.rsqrt %19 : vector<8x1xf32>
    %21 = vector.broadcast %20 : vector<8x1xf32> to vector<8x2048xf32>
    %22 = arith.mulf %17, %21 : vector<8x2048xf32>
    %c0_9 = arith.constant 0 : index
    %c0_10 = arith.constant 0 : index
    %23 = vector.load %arg2[%c0_9, %c0_10] : memref<8x1xf32, #tpu.memory_space<vmem>>, vector<8x1xf32>
    %24 = vector.broadcast %23 : vector<8x1xf32> to vector<8x2048xf32>
    %25 = arith.mulf %22, %24 : vector<8x2048xf32>
    %c0_11 = arith.constant 0 : index
    %c0_12 = arith.constant 0 : index
    %26 = vector.load %arg3[%c0_11, %c0_12] : memref<8x1xf32, #tpu.memory_space<vmem>>, vector<8x1xf32>
    %27 = vector.broadcast %26 : vector<8x1xf32> to vector<8x2048xf32>
    %28 = arith.addf %25, %27 : vector<8x2048xf32>
    %cst_13 = arith.constant 0.000000e+00 : f32
    %29 = vector.broadcast %cst_13 : f32 to vector<8x2048xf32>
    %30 = arith.maximumf %28, %29 : vector<8x2048xf32>
    %31 = vector.extract_strided_slice %30 {offsets = [0, 0], sizes = [8, 512], strides = [1, 1]} : vector<8x2048xf32> to vector<8x512xf32>
    %32 = vector.extract_strided_slice %30 {offsets = [0, 512], sizes = [8, 512], strides = [1, 1]} : vector<8x2048xf32> to vector<8x512xf32>
    %33 = arith.maximumf %31, %32 : vector<8x512xf32>
    %34 = vector.extract_strided_slice %30 {offsets = [0, 1024], sizes = [8, 512], strides = [1, 1]} : vector<8x2048xf32> to vector<8x512xf32>
    %35 = vector.extract_strided_slice %30 {offsets = [0, 1536], sizes = [8, 512], strides = [1, 1]} : vector<8x2048xf32> to vector<8x512xf32>
    %36 = arith.maximumf %34, %35 : vector<8x512xf32>
    %37 = arith.maximumf %33, %36 : vector<8x512xf32>
    %c0_14 = arith.constant 0 : index
    %c0_15 = arith.constant 0 : index
    %38 = vector.load %arg4[%c0_14, %c0_15] : memref<8x512xf32, #tpu.memory_space<vmem>>, vector<8x512xf32>
    tpu.vector_store %arg4[%c0_14, %c0_15], %37 {strides = array<i32>} : memref<8x512xf32, #tpu.memory_space<vmem>>, vector<8x512xf32>,
    return
  }
}

module attributes {stable_mosaic.version = 11 : i64} {
  func.func @conv_bn_relu_pool_kernel(%arg0: memref<256x512xbf16, #tpu.memory_space<vmem>>, %arg1: memref<8x256xbf16, #tpu.memory_space<vmem>>, %arg2: memref<8x1xf32, #tpu.memory_space<vmem>>, %arg3: memref<8x1xf32, #tpu.memory_space<vmem>>, %arg4: memref<8x128xf32, #tpu.memory_space<vmem>>) attributes {dimension_semantics = [], scalar_prefetch = 0 : i64, scratch_operands = 0 : i64, tpu.core_type = #tpu.core_type<tc>} {
    %c0 = arith.constant 0 : index
    %c0_0 = arith.constant 0 : index
    %0 = vector.load %arg1[%c0, %c0_0] : memref<8x256xbf16, #tpu.memory_space<vmem>>, vector<8x256xbf16>
    %c0_1 = arith.constant 0 : index
    %c0_2 = arith.constant 0 : index
    %1 = vector.load %arg0[%c0_1, %c0_2] : memref<256x512xbf16, #tpu.memory_space<vmem>>, vector<256x512xbf16>
    %cst = arith.constant dense<0.000000e+00> : vector<8x512xf32>
    %2 = tpu.matmul %0, %1, %cst {dimension_numbers = #tpu.dot_dimension_numbers<[1], [0], [0], [1], [0, 0, 1, 1], [], []>} : vector<8x256xbf16>, vector<256x512xbf16>, vector<8x512xf32> -> vector<8x512xf32>
    %cst_3 = arith.constant dense<0.000000e+00> : vector<8xf32>
    %3 = vector.multi_reduction <add>, %2, %cst_3 [1] : vector<8x512xf32> to vector<8xf32>
    %4 = vector.shape_cast %3 : vector<8xf32> to vector<8x1xf32>
    %cst_4 = arith.constant 5.120000e+02 : f32
    %5 = vector.broadcast %cst_4 : f32 to vector<8x1xf32>
    %6 = arith.divf %4, %5 : vector<8x1xf32>
    %7 = arith.mulf %2, %2 : vector<8x512xf32>
    %cst_5 = arith.constant dense<0.000000e+00> : vector<8xf32>
    %8 = vector.multi_reduction <add>, %7, %cst_5 [1] : vector<8x512xf32> to vector<8xf32>
    %9 = vector.shape_cast %8 : vector<8xf32> to vector<8x1xf32>
    %cst_6 = arith.constant 5.120000e+02 : f32
    %10 = vector.broadcast %cst_6 : f32 to vector<8x1xf32>
    %11 = arith.divf %9, %10 : vector<8x1xf32>
    %12 = arith.mulf %6, %6 : vector<8x1xf32>
    %13 = arith.subf %11, %12 : vector<8x1xf32>
    %cst_7 = arith.constant 0.000000e+00 : f32
    %14 = vector.broadcast %cst_7 : f32 to vector<8x1xf32>
    %15 = arith.maximumf %13, %14 : vector<8x1xf32>
    %16 = vector.broadcast %6 : vector<8x1xf32> to vector<8x512xf32>
    %17 = arith.subf %2, %16 : vector<8x512xf32>
    %cst_8 = arith.constant 9.99999974E-6 : f32
    %18 = vector.broadcast %cst_8 : f32 to vector<8x1xf32>
    %19 = arith.addf %15, %18 : vector<8x1xf32>
    %20 = math.rsqrt %19 : vector<8x1xf32>
    %21 = vector.broadcast %20 : vector<8x1xf32> to vector<8x512xf32>
    %22 = arith.mulf %17, %21 : vector<8x512xf32>
    %c0_9 = arith.constant 0 : index
    %c0_10 = arith.constant 0 : index
    %23 = vector.load %arg2[%c0_9, %c0_10] : memref<8x1xf32, #tpu.memory_space<vmem>>, vector<8x1xf32>
    %24 = vector.broadcast %23 : vector<8x1xf32> to vector<8x512xf32>
    %25 = arith.mulf %22, %24 : vector<8x512xf32>
    %c0_11 = arith.constant 0 : index
    %c0_12 = arith.constant 0 : index
    %26 = vector.load %arg3[%c0_11, %c0_12] : memref<8x1xf32, #tpu.memory_space<vmem>>, vector<8x1xf32>
    %27 = vector.broadcast %26 : vector<8x1xf32> to vector<8x512xf32>
    %28 = arith.addf %25, %27 : vector<8x512xf32>
    %cst_13 = arith.constant 0.000000e+00 : f32
    %29 = vector.broadcast %cst_13 : f32 to vector<8x512xf32>
    %30 = arith.maximumf %28, %29 : vector<8x512xf32>
    %31 = vector.extract_strided_slice %30 {offsets = [0, 0], sizes = [8, 128], strides = [1, 1]} : vector<8x512xf32> to vector<8x128xf32>
    %32 = vector.extract_strided_slice %30 {offsets = [0, 128], sizes = [8, 128], strides = [1, 1]} : vector<8x512xf32> to vector<8x128xf32>
    %33 = arith.maximumf %31, %32 : vector<8x128xf32>
    %34 = vector.extract_strided_slice %30 {offsets = [0, 256], sizes = [8, 128], strides = [1, 1]} : vector<8x512xf32> to vector<8x128xf32>
    %35 = vector.extract_strided_slice %30 {offsets = [0, 384], sizes = [8, 128], strides = [1, 1]} : vector<8x512xf32> to vector<8x128xf32>
    %36 = arith.maximumf %34, %35 : vector<8x128xf32>
    %37 = arith.maximumf %33, %36 : vector<8x128xf32>
    %c0_14 = arith.constant 0 : index
    %c0_15 = arith.constant 0 : index
    %38 = vector.load %arg4[%c0_14, %c0_15] : memref<8x128xf32, #tpu.memory_space<vmem>>, vector<8x128xf32>
    tpu.vector_store %arg4[%c0_14, %c0_15], %37 {strides = array<i32>} : memref<8x128xf32, #tpu.memory_space<vmem>>, vector<8x128xf32>,
    return
  }
}

module attributes {stable_mosaic.version = 11 : i64} {
  func.func @matmul_bias_kernel(%arg0: memref<8x128xbf16, #tpu.memory_space<vmem>>, %arg1: memref<128x128xbf16, #tpu.memory_space<vmem>>, %arg2: memref<1x128xf32, #tpu.memory_space<vmem>>, %arg3: memref<8x128xf32, #tpu.memory_space<vmem>>) attributes {dimension_semantics = [], scalar_prefetch = 0 : i64, scratch_operands = 0 : i64, tpu.core_type = #tpu.core_type<tc>} {
    %c0 = arith.constant 0 : index
    %c0_0 = arith.constant 0 : index
    %0 = vector.load %arg0[%c0, %c0_0] : memref<8x128xbf16, #tpu.memory_space<vmem>>, vector<8x128xbf16>
    %c0_1 = arith.constant 0 : index
    %c0_2 = arith.constant 0 : index
    %1 = vector.load %arg1[%c0_1, %c0_2] : memref<128x128xbf16, #tpu.memory_space<vmem>>, vector<128x128xbf16>
    %cst = arith.constant dense<0.000000e+00> : vector<8x128xf32>
    %2 = tpu.matmul %0, %1, %cst {dimension_numbers = #tpu.dot_dimension_numbers<[1], [0], [0], [1], [0, 0, 1, 1], [], []>} : vector<8x128xbf16>, vector<128x128xbf16>, vector<8x128xf32> -> vector<8x128xf32>
    %c0_3 = arith.constant 0 : index
    %c0_4 = arith.constant 0 : index
    %3 = vector.load %arg2[%c0_3, %c0_4] : memref<1x128xf32, #tpu.memory_space<vmem>>, vector<1x128xf32>
    %4 = vector.broadcast %3 : vector<1x128xf32> to vector<8x128xf32>
    %5 = arith.addf %2, %4 : vector<8x128xf32>
    %c0_5 = arith.constant 0 : index
    %c0_6 = arith.constant 0 : index
    %6 = vector.load %arg3[%c0_5, %c0_6] : memref<8x128xf32, #tpu.memory_space<vmem>>, vector<8x128xf32>
    tpu.vector_store %arg3[%c0_5, %c0_6], %5 {strides = array<i32>} : memref<8x128xf32, #tpu.memory_space<vmem>>, vector<8x128xf32>,
    return
  }
}

module attributes {stable_mosaic.version = 11 : i64} {
  func.func @pair_mlp_kernel(%arg0: memref<4x128xf32, #tpu.memory_space<vmem>>, %arg1: memref<4x128xf32, #tpu.memory_space<vmem>>, %arg2: memref<128x32xbf16, #tpu.memory_space<vmem>>, %arg3: memref<128x32xbf16, #tpu.memory_space<vmem>>, %arg4: memref<1x32xf32, #tpu.memory_space<vmem>>, %arg5: memref<1x1xf32, #tpu.memory_space<smem>>, %arg6: memref<4x4xf32, #tpu.memory_space<vmem>>) attributes {dimension_semantics = [], scalar_prefetch = 0 : i64, scratch_operands = 0 : i64, tpu.core_type = #tpu.core_type<tc>} {
    %c0 = arith.constant 0 : index
    %c0_0 = arith.constant 0 : index
    %0 = vector.load %arg0[%c0, %c0_0] : memref<4x128xf32, #tpu.memory_space<vmem>>, vector<4x128xf32>
    %1 = arith.truncf %0 : vector<4x128xf32> to vector<4x128xbf16>
    %c0_1 = arith.constant 0 : index
    %c0_2 = arith.constant 0 : index
    %2 = vector.load %arg2[%c0_1, %c0_2] : memref<128x32xbf16, #tpu.memory_space<vmem>>, vector<128x32xbf16>
    %cst = arith.constant dense<0.000000e+00> : vector<4x32xf32>
    %3 = tpu.matmul %1, %2, %cst {dimension_numbers = #tpu.dot_dimension_numbers<[1], [0], [0], [1], [0, 0, 1, 1], [], []>} : vector<4x128xbf16>, vector<128x32xbf16>, vector<4x32xf32> -> vector<4x32xf32>
    %c0_3 = arith.constant 0 : index
    %c0_4 = arith.constant 0 : index
    %4 = vector.load %arg1[%c0_3, %c0_4] : memref<4x128xf32, #tpu.memory_space<vmem>>, vector<4x128xf32>
    %5 = arith.truncf %4 : vector<4x128xf32> to vector<4x128xbf16>
    %c0_5 = arith.constant 0 : index
    %c0_6 = arith.constant 0 : index
    %6 = vector.load %arg3[%c0_5, %c0_6] : memref<128x32xbf16, #tpu.memory_space<vmem>>, vector<128x32xbf16>
    %cst_7 = arith.constant dense<0.000000e+00> : vector<4x32xf32>
    %7 = tpu.matmul %5, %6, %cst_7 {dimension_numbers = #tpu.dot_dimension_numbers<[1], [0], [0], [1], [0, 0, 1, 1], [], []>} : vector<4x128xbf16>, vector<128x32xbf16>, vector<4x32xf32> -> vector<4x32xf32>
    %8 = vector.shape_cast %3 : vector<4x32xf32> to vector<4x1x32xf32>
    %9 = vector.shape_cast %7 : vector<4x32xf32> to vector<1x4x32xf32>
    %10 = vector.broadcast %8 : vector<4x1x32xf32> to vector<4x4x32xf32>
    %11 = vector.broadcast %9 : vector<1x4x32xf32> to vector<4x4x32xf32>
    %12 = arith.addf %10, %11 : vector<4x4x32xf32>
    %cst_8 = arith.constant 0.000000e+00 : f32
    %13 = vector.broadcast %cst_8 : f32 to vector<4x4x32xf32>
    %14 = arith.maximumf %12, %13 : vector<4x4x32xf32>
    %c0_9 = arith.constant 0 : index
    %c0_10 = arith.constant 0 : index
    %15 = vector.load %arg4[%c0_9, %c0_10] : memref<1x32xf32, #tpu.memory_space<vmem>>, vector<1x32xf32>
    %16 = vector.shape_cast %15 : vector<1x32xf32> to vector<1x1x32xf32>
    %17 = vector.broadcast %16 : vector<1x1x32xf32> to vector<4x4x32xf32>
    %18 = arith.mulf %14, %17 : vector<4x4x32xf32>
    %cst_11 = arith.constant dense<0.000000e+00> : vector<4x4xf32>
    %19 = vector.multi_reduction <add>, %18, %cst_11 [2] : vector<4x4x32xf32> to vector<4x4xf32>
    %c0_12 = arith.constant 0 : index
    %c0_13 = arith.constant 0 : index
    %20 = memref.load %arg5[%c0_12, %c0_13] : memref<1x1xf32, #tpu.memory_space<smem>>
    %21 = vector.broadcast %20 : f32 to vector<4x4xf32>
    %22 = arith.addf %19, %21 : vector<4x4xf32>
    %cst_14 = arith.constant 0.000000e+00 : f32
    %23 = vector.broadcast %cst_14 : f32 to vector<4x4xf32>
    %24 = arith.subf %23, %22 : vector<4x4xf32>
    %25 = math.exp %24 : vector<4x4xf32>
    %cst_15 = arith.constant 1.000000e+00 : f32
    %26 = vector.broadcast %cst_15 : f32 to vector<4x4xf32>
    %27 = arith.addf %26, %25 : vector<4x4xf32>
    %cst_16 = arith.constant 1.000000e+00 : f32
    %28 = vector.broadcast %cst_16 : f32 to vector<4x4xf32>
    %29 = arith.divf %28, %27 : vector<4x4xf32>
    %c0_17 = arith.constant 0 : index
    %c0_18 = arith.constant 0 : index
    %30 = vector.load %arg6[%c0_17, %c0_18] : memref<4x4xf32, #tpu.memory_space<vmem>>, vector<4x4xf32>
    tpu.vector_store %arg6[%c0_17, %c0_18], %29 {strides = array<i32>} : memref<4x4xf32, #tpu.memory_space<vmem>>, vector<4x4xf32>,
    return
  }
}

</mosaic_0001>

<bundles_post_ra>
// kernel: relation_network_forward.4
= control target key start
LH: loop header
LB: loop body
LE: loop exit
PB: predicated region body
PF: predicated region fallthrough
CT: control target
= control target key end

     0   :  { %v1418_v3 = vmov 0   ;;  %s1947_s0 = inlined_call_operand.vmem [shape: bf16[128,2048], index: 0, kind: input, shape index: {}]   ;;  %s1948_s1 = inlined_call_operand.vmem [shape: bf16[8,128], index: 1, kind: input, shape index: {}]   ;;  %s1949_s2 = inlined_call_operand.vmem [shape: f32[8,1], index: 2, kind: input, shape index: {}]   ;;  %s1950_s3 = inlined_call_operand.vmem [shape: f32[8,1], index: 3, kind: input, shape index: {}]   ;;  %s1951_s4 = inlined_call_operand.vmem [shape: f32[8,512], index: 4, kind: output, shape index: {}]  }
   0x1   :  { %v131_v0 = vld [vmem:[%s1947_s0 + $0x380] sm:$0xff]  ;;  %v132_v2 = vld [vmem:[%s1947_s0 + $0x388] sm:$0xff]  ;;  %819 = vmatprep.mubr.bf16.mxu0 %v1418_v3  ;;  %860 = vmatprep.mubr.bf16.mxu1 %v1418_v3  ;;  %v133_v63 = vld [vmem:[%s1947_s0 + $0x390] sm:$0xff] }
   0x2   :  { %v139_v1 = vld [vmem:[%s1947_s0 + $0x3c0] sm:$0xff]  ;;  %v140_v5 = vld [vmem:[%s1947_s0 + $0x3c8] sm:$0xff]  ;;  %1414 = vset.pattern.permute.xlu1 %v1418_v3  ;;  %1415 = vset.pattern.permute.xlu0 %v1418_v3 }
   0x3   :  { %v1398_v4 = vcombine.high %v131_v0, %v139_v1  ;;  %v1397_v6 = vcombine.low %v131_v0, %v139_v1  ;;  %v115_v7 = vld [vmem:[%s1947_s0 + $0x300] sm:$0xff]  ;;  %v1400_v9 = vcombine.high %v132_v2, %v140_v5  ;;  %v1399_v10 = vcombine.low %v132_v2, %v140_v5  ;;  %v116_v12 = vld [vmem:[%s1947_s0 + $0x308] sm:$0xff]  ;;  %v141_v0 = vld [vmem:[%s1947_s0 + $0x3d0] sm:$0xff] }
   0x4   :  { %v123_v8 = vld [vmem:[%s1947_s0 + $0x340] sm:$0xff]  ;;  %v124_v13 = vld [vmem:[%s1947_s0 + $0x348] sm:$0xff]  ;;  %v134_v1 = vld [vmem:[%s1947_s0 + $0x398] sm:$0xff] }
   0x5   :  { %v1382_v11 = vcombine.high %v115_v7, %v123_v8  ;;  %v99_v14 = vld [vmem:[%s1947_s0 + $0x280] sm:$0xff]  ;;  %787 = vmatprep.subr.bf16.mxu0 %v1398_v4  ;;  %v1384_v15 = vcombine.high %v116_v12, %v124_v13  ;;  %v100_v17 = vld [vmem:[%s1947_s0 + $0x288] sm:$0xff]  ;;  %828 = vmatprep.subr.bf16.mxu1 %v1400_v9  ;;  %v1381_v19 = vcombine.low %v115_v7, %v123_v8  ;;  %v142_v2 = vld [vmem:[%s1947_s0 + $0x3d8] sm:$0xff] }
   0x6   :  { %v107_v16 = vld [vmem:[%s1947_s0 + $0x2c0] sm:$0xff]  ;;  %v108_v18 = vld [vmem:[%s1947_s0 + $0x2c8] sm:$0xff]  ;;  %788 = vmatpush1.bf16.msra.mxu0 %v1397_v6  ;;  %829 = vmatpush1.bf16.msra.mxu1 %v1399_v10  ;;  %v1383_v20 = vcombine.low %v116_v12, %v124_v13  ;;  %v1402_v6 = vcombine.high %v133_v63, %v141_v0  ;;  %v1404_v7 = vcombine.high %v134_v1, %v142_v2  ;;  %v117_v8 = vld [vmem:[%s1947_s0 + $0x310] sm:$0xff] }
   0x7   :  { %789 = vmatprep.subr.bf16.mxu0 %v1382_v11  ;;  %v1366_v21 = vcombine.high %v99_v14, %v107_v16  ;;  %830 = vmatprep.subr.bf16.mxu1 %v1384_v15  ;;  %v1368_v22 = vcombine.high %v100_v17, %v108_v18  ;;  %v83_v23 = vld [vmem:[%s1947_s0 + $0x200] sm:$0xff]  ;;  %v84_v25 = vld [vmem:[%s1947_s0 + $0x208] sm:$0xff]  ;;  %v1365_v27 = vcombine.low %v99_v14, %v107_v16  ;;  %v125_v9 = vld [vmem:[%s1947_s0 + $0x350] sm:$0xff] }
   0x8   :  { %v91_v24 = vld [vmem:[%s1947_s0 + $0x240] sm:$0xff]  ;;  %v92_v26 = vld [vmem:[%s1947_s0 + $0x248] sm:$0xff]  ;;  %v1367_v28 = vcombine.low %v100_v17, %v108_v18  ;;  %v118_v10 = vld [vmem:[%s1947_s0 + $0x318] sm:$0xff]  ;;  %v1401_v13 = vcombine.low %v133_v63, %v141_v0  ;;  %v1403_v14 = vcombine.low %v134_v1, %v142_v2  ;;  %v1386_v15 = vcombine.high %v117_v8, %v125_v9 }
   0x9   :  { %v1350_v29 = vcombine.high %v83_v23, %v91_v24  ;;  %v1352_v30 = vcombine.high %v84_v25, %v92_v26  ;;  %v67_v31 = vld [vmem:[%s1947_s0 + $0x180] sm:$0xff]  ;;  %v68_v33 = vld [vmem:[%s1947_s0 + $0x188] sm:$0xff]  ;;  %v1349_v35 = vcombine.low %v83_v23, %v91_v24  ;;  %v1351_v36 = vcombine.low %v84_v25, %v92_v26  ;;  %v126_v11 = vld [vmem:[%s1947_s0 + $0x358] sm:$0xff] }
   0xa   :  { %790 = vmatpush1.bf16.msra.mxu0 %v1381_v19  ;;  %831 = vmatpush1.bf16.msra.mxu1 %v1383_v20  ;;  %v75_v32 = vld [vmem:[%s1947_s0 + $0x1c0] sm:$0xff]  ;;  %v76_v34 = vld [vmem:[%s1947_s0 + $0x1c8] sm:$0xff]  ;;  %v1388_v16 = vcombine.high %v118_v10, %v126_v11  ;;  %v101_v17 = vld [vmem:[%s1947_s0 + $0x290] sm:$0xff] }
   0xb   :  { %791 = vmatprep.subr.bf16.mxu0 %v1366_v21  ;;  %832 = vmatprep.subr.bf16.mxu1 %v1368_v22  ;;  %v1334_v37 = vcombine.high %v67_v31, %v75_v32  ;;  %v1336_v38 = vcombine.high %v68_v33, %v76_v34  ;;  %v51_v39 = vld [vmem:[%s1947_s0 + $0x100] sm:$0xff]  ;;  %v52_v41 = vld [vmem:[%s1947_s0 + $0x108] sm:$0xff]  ;;  %v1333_v43 = vcombine.low %v67_v31, %v75_v32  ;;  %v109_v18 = vld [vmem:[%s1947_s0 + $0x2d0] sm:$0xff] }
   0xc   :  { %v59_v40 = vld [vmem:[%s1947_s0 + $0x140] sm:$0xff]  ;;  %v60_v42 = vld [vmem:[%s1947_s0 + $0x148] sm:$0xff]  ;;  %v1335_v44 = vcombine.low %v68_v33, %v76_v34  ;;  %v102_v19 = vld [vmem:[%s1947_s0 + $0x298] sm:$0xff]  ;;  %v1385_v21 = vcombine.low %v117_v8, %v125_v9  ;;  %v1387_v22 = vcombine.low %v118_v10, %v126_v11  ;;  %v1370_v23 = vcombine.high %v101_v17, %v109_v18 }
   0xd   :  { %v1318_v45 = vcombine.high %v51_v39, %v59_v40  ;;  %v1320_v46 = vcombine.high %v52_v41, %v60_v42  ;;  %v35_v47 = vld [vmem:[%s1947_s0 + $0x80] sm:$0xff]  ;;  %v36_v49 = vld [vmem:[%s1947_s0 + $0x88] sm:$0xff]  ;;  %v1317_v51 = vcombine.low %v51_v39, %v59_v40  ;;  %v1319_v52 = vcombine.low %v52_v41, %v60_v42  ;;  %v110_v20 = vld [vmem:[%s1947_s0 + $0x2d8] sm:$0xff] }
   0xe   :  { %792 = vmatpush1.bf16.msra.mxu0 %v1365_v27  ;;  %833 = vmatpush1.bf16.msra.mxu1 %v1367_v28  ;;  %v43_v48 = vld [vmem:[%s1947_s0 + $0xc0] sm:$0xff]  ;;  %v44_v50 = vld [vmem:[%s1947_s0 + $0xc8] sm:$0xff]  ;;  %v1372_v24 = vcombine.high %v102_v19, %v110_v20  ;;  %v85_v25 = vld [vmem:[%s1947_s0 + $0x210] sm:$0xff] }
   0xf   :  { %793 = vmatprep.subr.bf16.mxu0 %v1350_v29  ;;  %834 = vmatprep.subr.bf16.mxu1 %v1352_v30  ;;  %v1302_v53 = vcombine.high %v35_v47, %v43_v48  ;;  %v1304_v54 = vcombine.high %v36_v49, %v44_v50  ;;  %v19_v55 = vld [vmem:[%s1947_s0] sm:$0xff]  ;;  %v20_v57 = vld [vmem:[%s1947_s0 + $0x8] sm:$0xff]  ;;  %v1301_v59 = vcombine.low %v35_v47, %v43_v48  ;;  %v93_v26 = vld [vmem:[%s1947_s0 + $0x250] sm:$0xff] }
  0x10   :  { %v27_v56 = vld [vmem:[%s1947_s0 + $0x40] sm:$0xff]  ;;  %v28_v58 = vld [vmem:[%s1947_s0 + $0x48] sm:$0xff]  ;;  %v1303_v60 = vcombine.low %v36_v49, %v44_v50  ;;  %v86_v27 = vld [vmem:[%s1947_s0 + $0x218] sm:$0xff]  ;;  %v1369_v29 = vcombine.low %v101_v17, %v109_v18  ;;  %v1371_v30 = vcombine.low %v102_v19, %v110_v20  ;;  %v1354_v31 = vcombine.high %v85_v25, %v93_v26 }
  0x11   :  { %v1286_v61 = vcombine.high %v19_v55, %v27_v56  ;;  %v1288_v62 = vcombine.high %v20_v57, %v28_v58  ;;  %v1285_v4 = vcombine.low %v19_v55, %v27_v56  ;;  %v1287_v5 = vcombine.low %v20_v57, %v28_v58  ;;  %v1571_v12 = vld [vmem:[%s1948_s1] sm:$0xf]  ;;  %v94_v28 = vld [vmem:[%s1947_s0 + $0x258] sm:$0xff]  ;;  %v69_v33 = vld [vmem:[%s1947_s0 + $0x190] sm:$0xff] }
  0x12   :  { %794 = vmatpush1.bf16.msra.mxu0 %v1349_v35  ;;  %835 = vmatpush1.bf16.msra.mxu1 %v1351_v36  ;;  %v1356_v32 = vcombine.high %v86_v27, %v94_v28  ;;  %v77_v34 = vld [vmem:[%s1947_s0 + $0x1d0] sm:$0xff]  ;;  %v70_v35 = vld [vmem:[%s1947_s0 + $0x198] sm:$0xff]  ;;  %v135_v1 = vld [vmem:[%s1947_s0 + $0x3a0] sm:$0xff] }
  0x13   :  { %795 = vmatprep.subr.bf16.mxu0 %v1334_v37  ;;  %836 = vmatprep.subr.bf16.mxu1 %v1336_v38  ;;  %v78_v36 = vld [vmem:[%s1947_s0 + $0x1d8] sm:$0xff]  ;;  %v1353_v37 = vcombine.low %v85_v25, %v93_v26  ;;  %v1355_v38 = vcombine.low %v86_v27, %v94_v28  ;;  %v1338_v39 = vcombine.high %v69_v33, %v77_v34  ;;  %v53_v41 = vld [vmem:[%s1947_s0 + $0x110] sm:$0xff]  ;;  %v143_v2 = vld [vmem:[%s1947_s0 + $0x3e0] sm:$0xff] }
  0x14   :  { %v1340_v40 = vcombine.high %v70_v35, %v78_v36  ;;  %v61_v42 = vld [vmem:[%s1947_s0 + $0x150] sm:$0xff]  ;;  %v1406_v8 = vcombine.high %v135_v1, %v143_v2  ;;  %v119_v10 = vld [vmem:[%s1947_s0 + $0x320] sm:$0xff] }
  0x15   :  { %v1322_v47 = vcombine.high %v53_v41, %v61_v42  ;;  %v37_v49 = vld [vmem:[%s1947_s0 + $0x90] sm:$0xff]  ;;  %v127_v11 = vld [vmem:[%s1947_s0 + $0x360] sm:$0xff] }
  0x16   :  { %796 = vmatpush1.bf16.msra.mxu0 %v1333_v43  ;;  %837 = vmatpush1.bf16.msra.mxu1 %v1335_v44  ;;  %v54_v43 = vld [vmem:[%s1947_s0 + $0x118] sm:$0xff]  ;;  %v45_v50 = vld [vmem:[%s1947_s0 + $0xd0] sm:$0xff]  ;;  %v1390_v17 = vcombine.high %v119_v10, %v127_v11  ;;  %v103_v19 = vld [vmem:[%s1947_s0 + $0x2a0] sm:$0xff] }
  0x17   :  { %797 = vmatprep.subr.bf16.mxu0 %v1318_v45  ;;  %838 = vmatprep.subr.bf16.mxu1 %v1320_v46  ;;  %v62_v44 = vld [vmem:[%s1947_s0 + $0x158] sm:$0xff]  ;;  %v1337_v45 = vcombine.low %v69_v33, %v77_v34  ;;  %v1339_v46 = vcombine.low %v70_v35, %v78_v36  ;;  %v1306_v55 = vcombine.high %v37_v49, %v45_v50  ;;  %v21_v57 = vld [vmem:[%s1947_s0 + $0x10] sm:$0xff]  ;;  %v111_v20 = vld [vmem:[%s1947_s0 + $0x2e0] sm:$0xff] }
  0x18   :  { %v1324_v48 = vcombine.high %v54_v43, %v62_v44  ;;  %v29_v58 = vld [vmem:[%s1947_s0 + $0x50] sm:$0xff]  ;;  %v1374_v25 = vcombine.high %v103_v19, %v111_v20  ;;  %v87_v27 = vld [vmem:[%s1947_s0 + $0x220] sm:$0xff] }
  0x19   :  { %v1290_v63 = vcombine.high %v21_v57, %v29_v58  ;;  %v95_v28 = vld [vmem:[%s1947_s0 + $0x260] sm:$0xff] }
  0x1a   :  { %798 = vmatpush1.bf16.msra.mxu0 %v1317_v51  ;;  %839 = vmatpush1.bf16.msra.mxu1 %v1319_v52  ;;  %v38_v51 = vld [vmem:[%s1947_s0 + $0x98] sm:$0xff]  ;;  %v1358_v33 = vcombine.high %v87_v27, %v95_v28  ;;  %v71_v35 = vld [vmem:[%s1947_s0 + $0x1a0] sm:$0xff] }
  0x1b   :  { %799 = vmatprep.subr.bf16.mxu0 %v1302_v53  ;;  %840 = vmatprep.subr.bf16.mxu1 %v1304_v54  ;;  %v46_v52 = vld [vmem:[%s1947_s0 + $0xd8] sm:$0xff]  ;;  %v1321_v53 = vcombine.low %v53_v41, %v61_v42  ;;  %v1323_v54 = vcombine.low %v54_v43, %v62_v44  ;;  %v79_v36 = vld [vmem:[%s1947_s0 + $0x1e0] sm:$0xff] }
  0x1c   :  { %v1308_v56 = vcombine.high %v38_v51, %v46_v52  ;;  %v1342_v41 = vcombine.high %v71_v35, %v79_v36  ;;  %v55_v43 = vld [vmem:[%s1947_s0 + $0x120] sm:$0xff] }
  0x1d   :  { %v63_v44 = vld [vmem:[%s1947_s0 + $0x160] sm:$0xff] }
  0x1e   :  { %800 = vmatpush1.bf16.msra.mxu0 %v1301_v59  ;;  %841 = vmatpush1.bf16.msra.mxu1 %v1303_v60  ;;  %v22_v59 = vld [vmem:[%s1947_s0 + $0x18] sm:$0xff] }
  0x1f   :  { %801 = vmatprep.subr.bf16.mxu0 %v1286_v61  ;;  %842 = vmatprep.subr.bf16.mxu1 %v1288_v62  ;;  %v30_v60 = vld [vmem:[%s1947_s0 + $0x58] sm:$0xff]  ;;  %v1305_v61 = vcombine.low %v37_v49, %v45_v50  ;;  %v1307_v62 = vcombine.low %v38_v51, %v46_v52  ;;  %v1326_v49 = vcombine.high %v55_v43, %v63_v44  ;;  %v39_v51 = vld [vmem:[%s1947_s0 + $0xa0] sm:$0xff] }
  0x20   :  { %v1292_v0 = vcombine.high %v22_v59, %v30_v60  ;;  %v47_v52 = vld [vmem:[%s1947_s0 + $0xe0] sm:$0xff] }
  0x22   :  { %802 = vmatpush1.bf16.msra.mxu0 %v1285_v4  ;;  %843 = vmatpush1.bf16.msra.mxu1 %v1287_v5  ;;  %v136_v4 = vld [vmem:[%s1947_s0 + $0x3a8] sm:$0xff] }
  0x23   :  { %869 = vmatprep.subr.bf16.mxu0 %v1402_v6  ;;  %910 = vmatprep.subr.bf16.mxu1 %v1404_v7  ;;  %v144_v5 = vld [vmem:[%s1947_s0 + $0x3e8] sm:$0xff]  ;;  %v1289_v6 = vcombine.low %v21_v57, %v29_v58  ;;  %v1291_v7 = vcombine.low %v22_v59, %v30_v60  ;;  %v1310_v57 = vcombine.high %v39_v51, %v47_v52  ;;  %v23_v59 = vld [vmem:[%s1947_s0 + $0x20] sm:$0xff] }
  0x24   :  { %v1408_v9 = vcombine.high %v136_v4, %v144_v5  ;;  %v31_v60 = vld [vmem:[%s1947_s0 + $0x60] sm:$0xff] }
  0x25   :  { %820 = vmatmul.mubr.bf16.vlgmr.msra.gmra.mxu0 %v1571_v12  ;;  %861 = vmatmul.mubr.bf16.vlgmr.msra.gmra.mxu1 %v1571_v12 }
  0x26   :  { %870 = vmatpush1.bf16.msra.mxu0 %v1401_v13  ;;  %911 = vmatpush1.bf16.msra.mxu1 %v1403_v14  ;;  %v120_v13 = vld [vmem:[%s1947_s0 + $0x328] sm:$0xff] }
  0x27   :  { %871 = vmatprep.subr.bf16.mxu0 %v1386_v15  ;;  %912 = vmatprep.subr.bf16.mxu1 %v1388_v16  ;;  %v128_v14 = vld [vmem:[%s1947_s0 + $0x368] sm:$0xff]  ;;  %v1405_v15 = vcombine.low %v135_v1, %v143_v2  ;;  %v1407_v16 = vcombine.low %v136_v4, %v144_v5  ;;  %v1294_v1 = vcombine.high %v23_v59, %v31_v60  ;;  %v137_v4 = vld [vmem:[%s1947_s0 + $0x3b0] sm:$0xff] }
  0x28   :  { %901 = vmatprep.mubr.bf16.mxu0 %v1418_v3  ;;  %942 = vmatprep.mubr.bf16.mxu1 %v1418_v3  ;;  %v1392_v18 = vcombine.high %v120_v13, %v128_v14  ;;  %v145_v5 = vld [vmem:[%s1947_s0 + $0x3f0] sm:$0xff] }
  0x2a   :  { %872 = vmatpush1.bf16.msra.mxu0 %v1385_v21  ;;  %913 = vmatpush1.bf16.msra.mxu1 %v1387_v22  ;;  %v104_v21 = vld [vmem:[%s1947_s0 + $0x2a8] sm:$0xff] }
  0x2b   :  { %873 = vmatprep.subr.bf16.mxu0 %v1370_v23  ;;  %914 = vmatprep.subr.bf16.mxu1 %v1372_v24  ;;  %v112_v22 = vld [vmem:[%s1947_s0 + $0x2e8] sm:$0xff]  ;;  %v1389_v23 = vcombine.low %v119_v10, %v127_v11  ;;  %v1391_v24 = vcombine.low %v120_v13, %v128_v14  ;;  %v1410_v10 = vcombine.high %v137_v4, %v145_v5  ;;  %v121_v13 = vld [vmem:[%s1947_s0 + $0x330] sm:$0xff] }
  0x2c   :  { %v1376_v26 = vcombine.high %v104_v21, %v112_v22  ;;  %v129_v14 = vld [vmem:[%s1947_s0 + $0x370] sm:$0xff] }
  0x2e   :  { %874 = vmatpush1.bf16.msra.mxu0 %v1369_v29  ;;  %915 = vmatpush1.bf16.msra.mxu1 %v1371_v30  ;;  %v88_v29 = vld [vmem:[%s1947_s0 + $0x228] sm:$0xff] }
  0x2f   :  { %875 = vmatprep.subr.bf16.mxu0 %v1354_v31  ;;  %916 = vmatprep.subr.bf16.mxu1 %v1356_v32  ;;  %v96_v30 = vld [vmem:[%s1947_s0 + $0x268] sm:$0xff]  ;;  %v1373_v31 = vcombine.low %v103_v19, %v111_v20  ;;  %v1375_v32 = vcombine.low %v104_v21, %v112_v22  ;;  %v1394_v19 = vcombine.high %v121_v13, %v129_v14  ;;  %v105_v21 = vld [vmem:[%s1947_s0 + $0x2b0] sm:$0xff] }
  0x30   :  { %v1360_v34 = vcombine.high %v88_v29, %v96_v30  ;;  %v113_v22 = vld [vmem:[%s1947_s0 + $0x2f0] sm:$0xff] }
  0x32   :  { %876 = vmatpush1.bf16.msra.mxu0 %v1353_v37  ;;  %917 = vmatpush1.bf16.msra.mxu1 %v1355_v38  ;;  %v72_v37 = vld [vmem:[%s1947_s0 + $0x1a8] sm:$0xff] }
  0x33   :  { %877 = vmatprep.subr.bf16.mxu0 %v1338_v39  ;;  %918 = vmatprep.subr.bf16.mxu1 %v1340_v40  ;;  %v80_v38 = vld [vmem:[%s1947_s0 + $0x1e8] sm:$0xff]  ;;  %v1357_v39 = vcombine.low %v87_v27, %v95_v28  ;;  %v1359_v40 = vcombine.low %v88_v29, %v96_v30  ;;  %v1378_v27 = vcombine.high %v105_v21, %v113_v22  ;;  %v89_v29 = vld [vmem:[%s1947_s0 + $0x230] sm:$0xff] }
  0x34   :  { %v1344_v42 = vcombine.high %v72_v37, %v80_v38  ;;  %v97_v30 = vld [vmem:[%s1947_s0 + $0x270] sm:$0xff] }
  0x36   :  { %878 = vmatpush1.bf16.msra.mxu0 %v1337_v45  ;;  %919 = vmatpush1.bf16.msra.mxu1 %v1339_v46  ;;  %v56_v45 = vld [vmem:[%s1947_s0 + $0x128] sm:$0xff] }
  0x37   :  { %879 = vmatprep.subr.bf16.mxu0 %v1322_v47  ;;  %920 = vmatprep.subr.bf16.mxu1 %v1324_v48  ;;  %v64_v46 = vld [vmem:[%s1947_s0 + $0x168] sm:$0xff]  ;;  %v1341_v47 = vcombine.low %v71_v35, %v79_v36  ;;  %v1343_v48 = vcombine.low %v72_v37, %v80_v38  ;;  %v1362_v35 = vcombine.high %v89_v29, %v97_v30  ;;  %v73_v37 = vld [vmem:[%s1947_s0 + $0x1b0] sm:$0xff] }
  0x38   :  { %v1328_v50 = vcombine.high %v56_v45, %v64_v46  ;;  %v81_v38 = vld [vmem:[%s1947_s0 + $0x1f0] sm:$0xff] }
  0x3a   :  { %880 = vmatpush1.bf16.msra.mxu0 %v1321_v53  ;;  %921 = vmatpush1.bf16.msra.mxu1 %v1323_v54  ;;  %v40_v53 = vld [vmem:[%s1947_s0 + $0xa8] sm:$0xff] }
  0x3b   :  { %881 = vmatprep.subr.bf16.mxu0 %v1306_v55  ;;  %922 = vmatprep.subr.bf16.mxu1 %v1308_v56  ;;  %v48_v54 = vld [vmem:[%s1947_s0 + $0xe8] sm:$0xff]  ;;  %v1325_v55 = vcombine.low %v55_v43, %v63_v44  ;;  %v1327_v56 = vcombine.low %v56_v45, %v64_v46  ;;  %v57_v44 = vld [vmem:[%s1947_s0 + $0x130] sm:$0xff]  ;;  %v58_v46 = vld [vmem:[%s1947_s0 + $0x138] sm:$0xff] }
  0x3c   :  { %v1312_v58 = vcombine.high %v40_v53, %v48_v54  ;;  %v65_v45 = vld [vmem:[%s1947_s0 + $0x170] sm:$0xff] }
  0x3e   :  { %882 = vmatpush1.bf16.msra.mxu0 %v1305_v61  ;;  %923 = vmatpush1.bf16.msra.mxu1 %v1307_v62  ;;  %v24_v61 = vld [vmem:[%s1947_s0 + $0x28] sm:$0xff] }
  0x3f   :  { %883 = vmatprep.subr.bf16.mxu0 %v1290_v63  ;;  %924 = vmatprep.subr.bf16.mxu1 %v1292_v0  ;;  %v32_v62 = vld [vmem:[%s1947_s0 + $0x68] sm:$0xff]  ;;  %v1309_v63 = vcombine.low %v39_v51, %v47_v52  ;;  %v1311_v0 = vcombine.low %v40_v53, %v48_v54  ;;  %v41_v52 = vld [vmem:[%s1947_s0 + $0xb0] sm:$0xff]  ;;  %v42_v54 = vld [vmem:[%s1947_s0 + $0xb8] sm:$0xff] }
  0x40   :  { %v1296_v2 = vcombine.high %v24_v61, %v32_v62  ;;  %v49_v53 = vld [vmem:[%s1947_s0 + $0xf0] sm:$0xff] }
  0x42   :  { %884 = vmatpush1.bf16.msra.mxu0 %v1289_v6  ;;  %925 = vmatpush1.bf16.msra.mxu1 %v1291_v7  ;;  %v138_v6 = vld [vmem:[%s1947_s0 + $0x3b8] sm:$0xff] }
  0x43   :  { %951 = vmatprep.subr.bf16.mxu0 %v1406_v8  ;;  %992 = vmatprep.subr.bf16.mxu1 %v1408_v9  ;;  %v146_v7 = vld [vmem:[%s1947_s0 + $0x3f8] sm:$0xff]  ;;  %v1293_v8 = vcombine.low %v23_v59, %v31_v60  ;;  %v1295_v9 = vcombine.low %v24_v61, %v32_v62  ;;  %v25_v60 = vld [vmem:[%s1947_s0 + $0x30] sm:$0xff] }
  0x44   :  { %v1412_v11 = vcombine.high %v138_v6, %v146_v7  ;;  %v33_v61 = vld [vmem:[%s1947_s0 + $0x70] sm:$0xff]  ;;  %v26_v62 = vld [vmem:[%s1947_s0 + $0x38] sm:$0xff] }
  0x45   :  { %902 = vmatmul.mubr.bf16.vlgmr.msra.gmra.mxu0 %v1571_v12  ;;  %943 = vmatmul.mubr.bf16.vlgmr.msra.gmra.mxu1 %v1571_v12 }
  0x46   :  { %952 = vmatpush1.bf16.msra.mxu0 %v1405_v15  ;;  %993 = vmatpush1.bf16.msra.mxu1 %v1407_v16  ;;  %v122_v15 = vld [vmem:[%s1947_s0 + $0x338] sm:$0xff] }
  0x47   :  { %953 = vmatprep.subr.bf16.mxu0 %v1390_v17  ;;  %994 = vmatprep.subr.bf16.mxu1 %v1392_v18  ;;  %v130_v16 = vld [vmem:[%s1947_s0 + $0x378] sm:$0xff]  ;;  %v1409_v17 = vcombine.low %v137_v4, %v145_v5  ;;  %v1411_v18 = vcombine.low %v138_v6, %v146_v7  ;;  %v1297_v5 = vcombine.low %v25_v60, %v33_v61  ;;  %v1205_v7 = vld [vmem:[%s1949_s2] sm:$0xff] }
  0x48   :  { %983 = vmatprep.mubr.bf16.mxu0 %v1418_v3  ;;  %1024 = vmatprep.mubr.bf16.mxu1 %v1418_v3  ;;  %v1396_v20 = vcombine.high %v122_v15, %v130_v16 }
  0x49   :  { %1208 = vperm.xlu1 %1414, %v1205_v7  }
  0x4a   :  { %954 = vmatpush1.bf16.msra.mxu0 %v1389_v23  ;;  %995 = vmatpush1.bf16.msra.mxu1 %v1391_v24  ;;  %v106_v23 = vld [vmem:[%s1947_s0 + $0x2b8] sm:$0xff] }
  0x4b   :  { %955 = vmatprep.subr.bf16.mxu0 %v1374_v25  ;;  %996 = vmatprep.subr.bf16.mxu1 %v1376_v26  ;;  %v114_v24 = vld [vmem:[%s1947_s0 + $0x2f8] sm:$0xff]  ;;  %v1393_v25 = vcombine.low %v121_v13, %v129_v14  ;;  %v1395_v26 = vcombine.low %v122_v15, %v130_v16 }
  0x4c   :  { %v1380_v28 = vcombine.high %v106_v23, %v114_v24 }
  0x4e   :  { %956 = vmatpush1.bf16.msra.mxu0 %v1373_v31  ;;  %997 = vmatpush1.bf16.msra.mxu1 %v1375_v32  ;;  %v90_v31 = vld [vmem:[%s1947_s0 + $0x238] sm:$0xff] }
  0x4f   :  { %957 = vmatprep.subr.bf16.mxu0 %v1358_v33  ;;  %998 = vmatprep.subr.bf16.mxu1 %v1360_v34  ;;  %v98_v32 = vld [vmem:[%s1947_s0 + $0x278] sm:$0xff]  ;;  %v1377_v33 = vcombine.low %v105_v21, %v113_v22  ;;  %v1379_v34 = vcombine.low %v106_v23, %v114_v24 }
  0x50   :  { %v1364_v36 = vcombine.high %v90_v31, %v98_v32 }
  0x52   :  { %958 = vmatpush1.bf16.msra.mxu0 %v1357_v39  ;;  %999 = vmatpush1.bf16.msra.mxu1 %v1359_v40  ;;  %v82_v39 = vld [vmem:[%s1947_s0 + $0x1f8] sm:$0xff]  ;;  %v1361_v40 = vcombine.low %v89_v29, %v97_v30 }
  0x53   :  { %959 = vmatprep.subr.bf16.mxu0 %v1342_v41  ;;  %1000 = vmatprep.subr.bf16.mxu1 %v1344_v42  ;;  %v1363_v41 = vcombine.low %v90_v31, %v98_v32  ;;  %v1346_v42 = vcombine.high %v73_v37, %v81_v38 }
  0x56   :  { %960 = vmatpush1.bf16.msra.mxu0 %v1341_v47  ;;  %1001 = vmatpush1.bf16.msra.mxu1 %v1343_v48  ;;  %v66_v47 = vld [vmem:[%s1947_s0 + $0x178] sm:$0xff]  ;;  %v1345_v48 = vcombine.low %v73_v37, %v81_v38 }
  0x57   :  { %961 = vmatprep.subr.bf16.mxu0 %v1326_v49  ;;  %1002 = vmatprep.subr.bf16.mxu1 %v1328_v50  ;;  %v1330_v50 = vcombine.high %v57_v44, %v65_v45  ;;  %v1332_v51 = vcombine.high %v58_v46, %v66_v47 }
  0x5a   :  { %962 = vmatpush1.bf16.msra.mxu0 %v1325_v55  ;;  %1003 = vmatpush1.bf16.msra.mxu1 %v1327_v56  ;;  %v50_v55 = vld [vmem:[%s1947_s0 + $0xf8] sm:$0xff]  ;;  %v1329_v56 = vcombine.low %v57_v44, %v65_v45 }
  0x5b   :  { %963 = vmatprep.subr.bf16.mxu0 %v1310_v57  ;;  %1004 = vmatprep.subr.bf16.mxu1 %v1312_v58  ;;  %v1331_v57 = vcombine.low %v58_v46, %v66_v47  ;;  %v1314_v58 = vcombine.high %v41_v52, %v49_v53  ;;  %v1316_v59 = vcombine.high %v42_v54, %v50_v55 }
  0x5e   :  { %964 = vmatpush1.bf16.msra.mxu0 %v1309_v63  ;;  %1005 = vmatpush1.bf16.msra.mxu1 %v1311_v0  ;;  %v34_v63 = vld [vmem:[%s1947_s0 + $0x78] sm:$0xff]  ;;  %v1313_v0 = vcombine.low %v41_v52, %v49_v53 }
  0x5f   :  { %965 = vmatprep.subr.bf16.mxu0 %v1294_v1  ;;  %1006 = vmatprep.subr.bf16.mxu1 %v1296_v2  ;;  %v1315_v1 = vcombine.low %v42_v54, %v50_v55  ;;  %v1298_v2 = vcombine.high %v25_v60, %v33_v61  ;;  %v1300_v4 = vcombine.high %v26_v62, %v34_v63 }
  0x60   :  { %v1299_v6 = vcombine.low %v26_v62, %v34_v63 }
  0x62   :  { %966 = vmatpush1.bf16.msra.mxu0 %v1293_v8  ;;  %1007 = vmatpush1.bf16.msra.mxu1 %v1295_v9  ;;  %v1227_v8 = vld [vmem:[%s1950_s3] sm:$0xff] }
  0x63   :  { %1033 = vmatprep.subr.bf16.mxu0 %v1410_v10  ;;  %1074 = vmatprep.subr.bf16.mxu1 %v1412_v11 }
  0x64   :  { %1230 = vperm.xlu1 %1414, %v1227_v8  }
  0x65   :  { %984 = vmatmul.mubr.bf16.vlgmr.msra.gmra.mxu0 %v1571_v12  ;;  %1025 = vmatmul.mubr.bf16.vlgmr.msra.gmra.mxu1 %v1571_v12 }
  0x66   :  { %1034 = vmatpush1.bf16.msra.mxu0 %v1409_v17  ;;  %1075 = vmatpush1.bf16.msra.mxu1 %v1411_v18 }
  0x67   :  { %1035 = vmatprep.subr.bf16.mxu0 %v1394_v19  ;;  %1076 = vmatprep.subr.bf16.mxu1 %v1396_v20 }
  0x68   :  { %1065 = vmatprep.mubr.bf16.mxu0 %v1418_v3  ;;  %1106 = vmatprep.mubr.bf16.mxu1 %v1418_v3  ;;  %v74_v3 = vld [vmem:[%s1947_s0 + $0x1b8] sm:$0xff] }
  0x69   :  { %v1348_v43 = vcombine.high %v74_v3, %v82_v39  ;;  %v1347_v49 = vcombine.low %v74_v3, %v82_v39 }
  0x6a   :  { %1036 = vmatpush1.bf16.msra.mxu0 %v1393_v25  ;;  %1077 = vmatpush1.bf16.msra.mxu1 %v1395_v26 }
  0x6b   :  { %1037 = vmatprep.subr.bf16.mxu0 %v1378_v27  ;;  %1078 = vmatprep.subr.bf16.mxu1 %v1380_v28 }
  0x6e   :  { %1038 = vmatpush1.bf16.msra.mxu0 %v1377_v33  ;;  %1079 = vmatpush1.bf16.msra.mxu1 %v1379_v34 }
  0x6f   :  { %1039 = vmatprep.subr.bf16.mxu0 %v1362_v35  ;;  %1080 = vmatprep.subr.bf16.mxu1 %v1364_v36 }
  0x72   :  { %1040 = vmatpush1.bf16.msra.mxu0 %v1361_v40  ;;  %1081 = vmatpush1.bf16.msra.mxu1 %v1363_v41 }
  0x73   :  { %1041 = vmatprep.subr.bf16.mxu0 %v1346_v42  ;;  %1082 = vmatprep.subr.bf16.mxu1 %v1348_v43 }
  0x76   :  { %1042 = vmatpush1.bf16.msra.mxu0 %v1345_v48  ;;  %1083 = vmatpush1.bf16.msra.mxu1 %v1347_v49 }
  0x77   :  { %1043 = vmatprep.subr.bf16.mxu0 %v1330_v50  ;;  %1084 = vmatprep.subr.bf16.mxu1 %v1332_v51 }
  0x7a   :  { %1044 = vmatpush1.bf16.msra.mxu0 %v1329_v56  ;;  %1085 = vmatpush1.bf16.msra.mxu1 %v1331_v57 }
  0x7b   :  { %1045 = vmatprep.subr.bf16.mxu0 %v1314_v58  ;;  %1086 = vmatprep.subr.bf16.mxu1 %v1316_v59 }
  0x7e   :  { %1046 = vmatpush1.bf16.msra.mxu0 %v1313_v0  ;;  %1087 = vmatpush1.bf16.msra.mxu1 %v1315_v1 }
  0x7f   :  { %1047 = vmatprep.subr.bf16.mxu0 %v1298_v2  ;;  %1088 = vmatprep.subr.bf16.mxu1 %v1300_v4 }
  0x82   :  { %1048 = vmatpush1.bf16.msra.mxu0 %v1297_v5  ;;  %1089 = vmatpush1.bf16.msra.mxu1 %v1299_v6 }
  0x85   :  { %1066 = vmatmul.mubr.bf16.vlgmr.msra.gmra.mxu0 %v1571_v12  ;;  %1107 = vmatmul.mubr.bf16.vlgmr.msra.gmra.mxu1 %v1571_v12 }
  0xe5   :  { %v1857_v9 = vpop.f32.mrf.mxu0  ;;  %v1859_v10 = vpop.f32.mrf.mxu1 }
  0xe6   :  { %v1134_v25 = vmul.f32 %v1857_v9, %v1857_v9  ;;  %v1136_v28 = vmul.f32 %v1859_v10, %v1859_v10 }
  0xe7   :  { %v1861_v11 = vpop.f32.mrf.mxu0  ;;  %v1863_v13 = vpop.f32.mrf.mxu1 }
  0xe8   :  { %v1135_v26 = vmul.f32 %v1861_v11, %v1861_v11  ;;  %v1115_v27 = vadd.f32 %v1861_v11, %v1857_v9  ;;  %v1137_v32 = vmul.f32 %v1863_v13, %v1863_v13 }
  0xe9   :  { %v825_v14 = vpop.f32.mrf.mxu0  ;;  %v866_v12 = vpop.f32.mrf.mxu1 }
  0xea   :  { %v1150_v29 = vadd.f32 %v1135_v26, %v1134_v25  ;;  %v1116_v30 = vadd.f32 %v1115_v27, %v1859_v10 }
  0xeb   :  { %v826_v15 = vpop.f32.mrf.mxu0  ;;  %v867_v16 = vpop.f32.mrf.mxu1 }
  0xec   :  { %v1151_v33 = vadd.f32 %v1150_v29, %v1136_v28  ;;  %v1117_v36 = vadd.f32 %v1116_v30, %v1863_v13 }
  0xee   :  { %v1152_v39 = vadd.f32 %v1151_v33, %v1137_v32 }
 0x105   :  { %v1865_v17 = vpop.f32.mrf.mxu0  ;;  %v1867_v18 = vpop.f32.mrf.mxu1 }
 0x106   :  { %v1138_v37 = vmul.f32 %v1865_v17, %v1865_v17  ;;  %v1118_v40 = vadd.f32 %v1117_v36, %v1865_v17  ;;  %v1140_v47 = vmul.f32 %v1867_v18, %v1867_v18 }
 0x107   :  { %v1869_v19 = vpop.f32.mrf.mxu0  ;;  %v1871_v20 = vpop.f32.mrf.mxu1 }
 0x108   :  { %v1153_v43 = vadd.f32 %v1152_v39, %v1138_v37  ;;  %v1139_v44 = vmul.f32 %v1869_v19, %v1869_v19  ;;  %v1119_v46 = vadd.f32 %v1118_v40, %v1869_v19  ;;  %v1141_v50 = vmul.f32 %v1871_v20, %v1871_v20 }
 0x109   :  { %v907_v21 = vpop.f32.mrf.mxu0  ;;  %v948_v22 = vpop.f32.mrf.mxu1 }
 0x10a   :  { %v1154_v48 = vadd.f32 %v1153_v43, %v1139_v44  ;;  %v1120_v49 = vadd.f32 %v1119_v46, %v1867_v18 }
 0x10b   :  { %v908_v23 = vpop.f32.mrf.mxu0  ;;  %v949_v24 = vpop.f32.mrf.mxu1 }
 0x10c   :  { %v1155_v51 = vadd.f32 %v1154_v48, %v1140_v47  ;;  %v1121_v52 = vadd.f32 %v1120_v49, %v1871_v20 }
 0x10e   :  { %v1156_v54 = vadd.f32 %v1155_v51, %v1141_v50 }
 0x125   :  { %v1882_v31 = vpop.f32.mrf.mxu0  ;;  %v1886_v34 = vpop.f32.mrf.mxu1 }
 0x126   :  { %v1142_v53 = vmul.f32 %v1882_v31, %v1882_v31  ;;  %v1122_v55 = vadd.f32 %v1121_v52, %v1882_v31  ;;  %v1144_v59 = vmul.f32 %v1886_v34, %v1886_v34 }
 0x127   :  { %v1888_v35 = vpop.f32.mrf.mxu0  ;;  %v1893_v38 = vpop.f32.mrf.mxu1 }
 0x128   :  { %v1157_v56 = vadd.f32 %v1156_v54, %v1142_v53  ;;  %v1143_v57 = vmul.f32 %v1888_v35, %v1888_v35  ;;  %v1123_v58 = vadd.f32 %v1122_v55, %v1888_v35  ;;  %v1145_v62 = vmul.f32 %v1893_v38, %v1893_v38 }
 0x129   :  { %v989_v3 = vpop.f32.mrf.mxu0  ;;  %v1030_v41 = vpop.f32.mrf.mxu1 }
 0x12a   :  { %v1158_v60 = vadd.f32 %v1157_v56, %v1143_v57  ;;  %v1124_v61 = vadd.f32 %v1123_v58, %v1886_v34  ;;  %v1209_v56 = vpop.permute.xlu1 %1208 }
 0x12b   :  { %v990_v42 = vpop.f32.mrf.mxu0  ;;  %v1031_v45 = vpop.f32.mrf.mxu1 }
 0x12c   :  { %v1159_v63 = vadd.f32 %v1158_v60, %v1144_v59  ;;  %v1125_v0 = vadd.f32 %v1124_v61, %v1893_v38 }
 0x12e   :  { %v1160_v2 = vadd.f32 %v1159_v63, %v1145_v62 }
 0x145   :  { %v1917_v1 = vpop.f32.mrf.mxu0  ;;  %v1108_v6 = vpop.f32.mrf.mxu1 }
 0x146   :  { %v1126_v4 = vadd.f32 %v1125_v0, %v1917_v1  ;;  %v1146_v5 = vmul.f32 %v1917_v1, %v1917_v1  ;;  %v1148_v14 = vmul.f32 %v1108_v6, %v1108_v6 }
 0x147   :  { %v1069_v7 = vpop.f32.mrf.mxu0  ;;  %v1110_v16 = vpop.f32.mrf.mxu1 }
 0x148   :  { %v1161_v8 = vadd.f32 %v1160_v2, %v1146_v5  ;;  %v1127_v12 = vadd.f32 %v1126_v4, %v1069_v7  ;;  %v1147_v15 = vmul.f32 %v1069_v7, %v1069_v7  ;;  %v1149_v29 = vmul.f32 %v1110_v16, %v1110_v16 }
 0x149   :  { %v1071_v21 = vpop.f32.mrf.mxu0  ;;  %v1112_v22 = vpop.f32.mrf.mxu1 }
 0x14a   :  { %v1128_v23 = vadd.f32 %v1127_v12, %v1108_v6  ;;  %v1162_v24 = vadd.f32 %v1161_v8, %v1147_v15  ;;  %v1231_v21 = vpop.permute.xlu1 %1230 }
 0x14b   :  { %v1072_v25 = vpop.f32.mrf.mxu0  ;;  %v1113_v26 = vpop.f32.mrf.mxu1 }
 0x14c   :  { %v1129_v27 = vadd.f32 %v1128_v23, %v1110_v16  ;;  %v1163_v28 = vadd.f32 %v1162_v24, %v1148_v14 }
 0x14e   :  { %1130 = vadd.xlane.f32.xlu0 %v1129_v27  ;;  %v1164_v30 = vadd.f32 %v1163_v28, %v1149_v29 }
 0x152   :  { %1165 = vadd.xlane.f32.xlu0 %v1164_v30 }
 0x1d7   :  { %v1131_v32 = vpop.xlane.xlu0 %1130 }
 0x1d8   :  { %v1133_v33 = vmul.f32 0.00048828125, %v1131_v32 }
 0x1da   :  { %v1168_v37 = vmul.f32 %v1133_v33, %v1133_v33  ;;  %v1171_v42 = vsub.f32 %v1857_v9, %v1133_v33  ;;  %v1172_v43 = vsub.f32 %v1861_v11, %v1133_v33  ;;  %v1173_v44 = vsub.f32 %v1859_v10, %v1133_v33 }
 0x1db   :  { %v1166_v36 = vpop.xlane.xlu0 %1165  ;;  %v1174_v45 = vsub.f32 %v1863_v13, %v1133_v33  ;;  %v1175_v46 = vsub.f32 %v1865_v17, %v1133_v33  ;;  %v1176_v47 = vsub.f32 %v1869_v19, %v1133_v33  ;;  %v1177_v48 = vsub.f32 %v1867_v18, %v1133_v33 }
 0x1dc   :  { %v1167_v3 = vmul.f32 0.00048828125, %v1166_v36  ;;  %v1178_v49 = vsub.f32 %v1871_v20, %v1133_v33  ;;  %v1179_v50 = vsub.f32 %v1882_v31, %v1133_v33  ;;  %v1180_v51 = vsub.f32 %v1888_v35, %v1133_v33 }
 0x1dd   :  { %v1181_v9 = vsub.f32 %v1886_v34, %v1133_v33  ;;  %v1182_v11 = vsub.f32 %v1893_v38, %v1133_v33  ;;  %v1183_v10 = vsub.f32 %v1917_v1, %v1133_v33  ;;  %v1184_v13 = vsub.f32 %v1069_v7, %v1133_v33 }
 0x1de   :  { %v1169_v39 = vsub.f32 %v1167_v3, %v1168_v37  ;;  %v1185_v53 = vsub.f32 %v1108_v6, %v1133_v33  ;;  %v1186_v17 = vsub.f32 %v1110_v16, %v1133_v33 }
 0x1e0   :  { %v1170_v40 = vmax.f32 %v1169_v39, 0.0 }
 0x1e2   :  { %v1187_v41 = vadd.f32 1e-05, %v1170_v40 }
 0x1e4   :  { %1416 = vrsqrt.f32 %v1187_v41 }
 0x1f1   :  { %v1417_v52 = vpop.eup %1416 }
 0x1f2   :  { %v1189_v54 = vmul.f32 %v1417_v52, %v1171_v42  ;;  %v1190_v19 = vmul.f32 %v1417_v52, %v1172_v43  ;;  %v1191_v55 = vmul.f32 %v1417_v52, %v1173_v44  ;;  %v1192_v18 = vmul.f32 %v1417_v52, %v1174_v45 }
 0x1f3   :  { %v1193_v20 = vmul.f32 %v1417_v52, %v1175_v46  ;;  %v1194_v57 = vmul.f32 %v1417_v52, %v1176_v47  ;;  %v1195_v31 = vmul.f32 %v1417_v52, %v1177_v48  ;;  %v1196_v58 = vmul.f32 %v1417_v52, %v1178_v49 }
 0x1f4   :  { %v1197_v35 = vmul.f32 %v1417_v52, %v1179_v50  ;;  %v1198_v59 = vmul.f32 %v1417_v52, %v1180_v51  ;;  %v1199_v34 = vmul.f32 %v1417_v52, %v1181_v9  ;;  %v1200_v60 = vmul.f32 %v1417_v52, %v1182_v11 }
 0x1f5   :  { %v1201_v38 = vmul.f32 %v1417_v52, %v1183_v10  ;;  %v1202_v61 = vmul.f32 %v1417_v52, %v1184_v13  ;;  %v1203_v62 = vmul.f32 %v1417_v52, %v1185_v53  ;;  %v1204_v63 = vmul.f32 %v1417_v52, %v1186_v17 }
 0x1f6   :  { %v1211_v0 = vmul.f32 %v1209_v56, %v1189_v54  ;;  %v1212_v1 = vmul.f32 %v1209_v56, %v1190_v19  ;;  %v1213_v2 = vmul.f32 %v1209_v56, %v1191_v55  ;;  %v1214_v4 = vmul.f32 %v1209_v56, %v1192_v18 }
 0x1f7   :  { %v1215_v5 = vmul.f32 %v1209_v56, %v1193_v20  ;;  %v1216_v6 = vmul.f32 %v1209_v56, %v1194_v57  ;;  %v1217_v7 = vmul.f32 %v1209_v56, %v1195_v31  ;;  %v1218_v8 = vmul.f32 %v1209_v56, %v1196_v58 }
 0x1f8   :  { %v1219_v14 = vmul.f32 %v1209_v56, %v1197_v35  ;;  %v1220_v12 = vmul.f32 %v1209_v56, %v1198_v59  ;;  %v1221_v15 = vmul.f32 %v1209_v56, %v1199_v34  ;;  %v1222_v16 = vmul.f32 %v1209_v56, %v1200_v60 }
 0x1f9   :  { %v1223_v22 = vmul.f32 %v1209_v56, %v1201_v38  ;;  %v1224_v23 = vmul.f32 %v1209_v56, %v1202_v61  ;;  %v1225_v24 = vmul.f32 %v1209_v56, %v1203_v62  ;;  %v1226_v25 = vmul.f32 %v1209_v56, %v1204_v63 }
 0x1fa   :  { %v1233_v26 = vadd.f32 %v1231_v21, %v1211_v0  ;;  %v1234_v27 = vadd.f32 %v1231_v21, %v1212_v1  ;;  %v1235_v28 = vadd.f32 %v1231_v21, %v1213_v2  ;;  %v1236_v29 = vadd.f32 %v1231_v21, %v1214_v4 }
 0x1fb   :  { %v1237_v30 = vadd.f32 %v1231_v21, %v1215_v5  ;;  %v1238_v32 = vadd.f32 %v1231_v21, %v1216_v6  ;;  %v1239_v33 = vadd.f32 %v1231_v21, %v1217_v7  ;;  %v1240_v36 = vadd.f32 %v1231_v21, %v1218_v8 }
 0x1fc   :  { %v1241_v37 = vadd.f32 %v1231_v21, %v1219_v14  ;;  %v1242_v3 = vadd.f32 %v1231_v21, %v1220_v12  ;;  %v1243_v39 = vadd.f32 %v1231_v21, %v1221_v15  ;;  %v1244_v40 = vadd.f32 %v1231_v21, %v1222_v16 }
 0x1fd   :  { %v1245_v41 = vadd.f32 %v1231_v21, %v1223_v22  ;;  %v1246_v42 = vadd.f32 %v1231_v21, %v1224_v23  ;;  %v1247_v43 = vadd.f32 %v1231_v21, %v1225_v24  ;;  %v1248_v44 = vadd.f32 %v1231_v21, %v1226_v25 }
 0x1fe   :  { %v1249_v45 = vmax.f32 %v1233_v26, 0.0  ;;  %v1250_v46 = vmax.f32 %v1234_v27, 0.0  ;;  %v1251_v47 = vmax.f32 %v1235_v28, 0.0  ;;  %v1252_v48 = vmax.f32 %v1236_v29, 0.0 }
 0x1ff   :  { %v1253_v49 = vmax.f32 %v1237_v30, 0.0  ;;  %v1254_v50 = vmax.f32 %v1238_v32, 0.0  ;;  %v1255_v51 = vmax.f32 %v1239_v33, 0.0  ;;  %v1256_v9 = vmax.f32 %v1240_v36, 0.0 }
 0x200   :  { %v1257_v11 = vmax.f32 %v1241_v37, 0.0  ;;  %v1258_v52 = vmax.f32 %v1242_v3, 0.0  ;;  %v1259_v10 = vmax.f32 %v1243_v39, 0.0  ;;  %v1260_v13 = vmax.f32 %v1244_v40, 0.0 }
 0x201   :  { %v1261_v53 = vmax.f32 %v1245_v41, 0.0  ;;  %v1262_v17 = vmax.f32 %v1246_v42, 0.0  ;;  %v1263_v54 = vmax.f32 %v1247_v43, 0.0  ;;  %v1264_v19 = vmax.f32 %v1248_v44, 0.0 }
 0x202   :  { %v1265_v55 = vmax.f32 %v1249_v45, %v1253_v49  ;;  %v1266_v18 = vmax.f32 %v1250_v46, %v1254_v50  ;;  %v1267_v56 = vmax.f32 %v1251_v47, %v1255_v51  ;;  %v1268_v20 = vmax.f32 %v1252_v48, %v1256_v9 }
 0x203   :  { %v1269_v57 = vmax.f32 %v1257_v11, %v1261_v53  ;;  %v1270_v31 = vmax.f32 %v1258_v52, %v1262_v17  ;;  %v1271_v58 = vmax.f32 %v1259_v10, %v1263_v54  ;;  %v1272_v35 = vmax.f32 %v1260_v13, %v1264_v19 }
 0x205   :  { %v1273_v59 = vmax.f32 %v1265_v55, %v1269_v57  ;;  %v1274_v34 = vmax.f32 %v1266_v18, %v1270_v31  ;;  %v1275_v60 = vmax.f32 %v1267_v56, %v1271_v58  ;;  %v1276_v38 = vmax.f32 %v1268_v20, %v1272_v35 }
 0x207   :  { %1277 = vst [vmem:[%s1951_s4] sm:$0xff] %v1273_v59  ;;  %1278 = vst [vmem:[%s1951_s4 + $0x8] sm:$0xff] %v1274_v34 }
 0x208   :  { %1279 = vst [vmem:[%s1951_s4 + $0x10] sm:$0xff] %v1275_v60  ;;  %1280 = vst [vmem:[%s1951_s4 + $0x18] sm:$0xff] %v1276_v38 }

// kernel: relation_network_forward.5
= control target key start
LH: loop header
LB: loop body
LE: loop exit
PB: predicated region body
PF: predicated region fallthrough
CT: control target
= control target key end

     0   :  { %s952_s0 = inlined_call_operand.vmem [shape: bf16[256,512], index: 0, kind: input, shape index: {}]   ;;  %s953_s1 = inlined_call_operand.vmem [shape: bf16[8,256], index: 1, kind: input, shape index: {}]   ;;  %s954_s2 = inlined_call_operand.vmem [shape: f32[8,1], index: 2, kind: input, shape index: {}]   ;;  %s955_s3 = inlined_call_operand.vmem [shape: f32[8,1], index: 3, kind: input, shape index: {}]   ;;  %s956_s4 = inlined_call_operand.vmem [shape: f32[8,128], index: 4, kind: output, shape index: {}]  }
   0x1   :  { %v622_v0 = vld [vmem:[%s952_s0 + $0xe4] ss:$16 sps:$4 sm:$0xff]   ;;  %v624_v1 = vld [vmem:[%s952_s0 + $0xec] ss:$16 sps:$4 sm:$0xff]   ;;  %v626_v2 = vld [vmem:[%s952_s0 + $0xe0] ss:$16 sps:$4 sm:$0xff]  }
   0x2   :  { %409 = vmatprep.subr.bf16.mxu0 %v622_v0  ;;  %v627_v3 = vld [vmem:[%s952_s0 + $0xe8] ss:$16 sps:$4 sm:$0xff]   ;;  %450 = vmatprep.subr.bf16.mxu1 %v624_v1  ;;  %v628_v4 = vld [vmem:[%s952_s0 + $0xc4] ss:$16 sps:$4 sm:$0xff]   ;;  %v630_v5 = vld [vmem:[%s952_s0 + $0xcc] ss:$16 sps:$4 sm:$0xff]  }
   0x3   :  { %410 = vmatpush1.bf16.msra.mxu0 %v626_v2  ;;  %451 = vmatpush1.bf16.msra.mxu1 %v627_v3  ;;  %v632_v6 = vld [vmem:[%s952_s0 + $0xc0] ss:$16 sps:$4 sm:$0xff]   ;;  %v633_v7 = vld [vmem:[%s952_s0 + $0xc8] ss:$16 sps:$4 sm:$0xff]   ;;  %v634_v8 = vld [vmem:[%s952_s0 + $0xa4] ss:$16 sps:$4 sm:$0xff]  }
   0x4   :  { %411 = vmatprep.subr.bf16.mxu0 %v628_v4  ;;  %452 = vmatprep.subr.bf16.mxu1 %v630_v5  ;;  %v636_v9 = vld [vmem:[%s952_s0 + $0xac] ss:$16 sps:$4 sm:$0xff]   ;;  %v638_v10 = vld [vmem:[%s952_s0 + $0xa0] ss:$16 sps:$4 sm:$0xff]   ;;  %v639_v11 = vld [vmem:[%s952_s0 + $0xa8] ss:$16 sps:$4 sm:$0xff]  }
   0x5   :  { %v640_v12 = vld [vmem:[%s952_s0 + $0x84] ss:$16 sps:$4 sm:$0xff]   ;;  %v642_v13 = vld [vmem:[%s952_s0 + $0x8c] ss:$16 sps:$4 sm:$0xff]   ;;  %v644_v14 = vld [vmem:[%s952_s0 + $0x80] ss:$16 sps:$4 sm:$0xff]  }
   0x6   :  { %v645_v15 = vld [vmem:[%s952_s0 + $0x88] ss:$16 sps:$4 sm:$0xff]   ;;  %v646_v16 = vld [vmem:[%s952_s0 + $0x64] ss:$16 sps:$4 sm:$0xff]   ;;  %v648_v17 = vld [vmem:[%s952_s0 + $0x6c] ss:$16 sps:$4 sm:$0xff]  }
   0x7   :  { %412 = vmatpush1.bf16.msra.mxu0 %v632_v6  ;;  %453 = vmatpush1.bf16.msra.mxu1 %v633_v7  ;;  %v650_v18 = vld [vmem:[%s952_s0 + $0x60] ss:$16 sps:$4 sm:$0xff]   ;;  %v651_v19 = vld [vmem:[%s952_s0 + $0x68] ss:$16 sps:$4 sm:$0xff]   ;;  %v652_v20 = vld [vmem:[%s952_s0 + $0x44] ss:$16 sps:$4 sm:$0xff]  }
   0x8   :  { %413 = vmatprep.subr.bf16.mxu0 %v634_v8  ;;  %454 = vmatprep.subr.bf16.mxu1 %v636_v9  ;;  %v654_v21 = vld [vmem:[%s952_s0 + $0x4c] ss:$16 sps:$4 sm:$0xff]   ;;  %v656_v22 = vld [vmem:[%s952_s0 + $0x40] ss:$16 sps:$4 sm:$0xff]   ;;  %v657_v23 = vld [vmem:[%s952_s0 + $0x48] ss:$16 sps:$4 sm:$0xff]  }
   0x9   :  { %v658_v24 = vld [vmem:[%s952_s0 + $0x24] ss:$16 sps:$4 sm:$0xff]   ;;  %v660_v25 = vld [vmem:[%s952_s0 + $0x2c] ss:$16 sps:$4 sm:$0xff]   ;;  %v662_v26 = vld [vmem:[%s952_s0 + $0x20] ss:$16 sps:$4 sm:$0xff]  }
   0xa   :  { %v663_v27 = vld [vmem:[%s952_s0 + $0x28] ss:$16 sps:$4 sm:$0xff]   ;;  %v664_v28 = vld [vmem:[%s952_s0 + $0x4] ss:$16 sps:$4 sm:$0xff]   ;;  %v666_v29 = vld [vmem:[%s952_s0 + $0xc] ss:$16 sps:$4 sm:$0xff]  }
   0xb   :  { %414 = vmatpush1.bf16.msra.mxu0 %v638_v10  ;;  %455 = vmatpush1.bf16.msra.mxu1 %v639_v11  ;;  %v668_v30 = vld [vmem:[%s952_s0] ss:$16 sps:$4 sm:$0xff]   ;;  %v669_v31 = vld [vmem:[%s952_s0 + $0x8] ss:$16 sps:$4 sm:$0xff]   ;;  %v670_v32 = vld [vmem:[%s952_s0 + $0x1e4] ss:$16 sps:$4 sm:$0xff]  }
   0xc   :  { %415 = vmatprep.subr.bf16.mxu0 %v640_v12  ;;  %456 = vmatprep.subr.bf16.mxu1 %v642_v13  ;;  %v672_v33 = vld [vmem:[%s952_s0 + $0x1ec] ss:$16 sps:$4 sm:$0xff]   ;;  %v674_v34 = vld [vmem:[%s952_s0 + $0x1e0] ss:$16 sps:$4 sm:$0xff]   ;;  %v675_v35 = vld [vmem:[%s952_s0 + $0x1e8] ss:$16 sps:$4 sm:$0xff]  }
   0xd   :  { %v676_v36 = vld [vmem:[%s952_s0 + $0x1c4] ss:$16 sps:$4 sm:$0xff]   ;;  %v678_v37 = vld [vmem:[%s952_s0 + $0x1cc] ss:$16 sps:$4 sm:$0xff]   ;;  %v680_v38 = vld [vmem:[%s952_s0 + $0x1c0] ss:$16 sps:$4 sm:$0xff]  }
   0xe   :  { %v681_v39 = vld [vmem:[%s952_s0 + $0x1c8] ss:$16 sps:$4 sm:$0xff]   ;;  %v682_v40 = vld [vmem:[%s952_s0 + $0x1a4] ss:$16 sps:$4 sm:$0xff]   ;;  %v684_v41 = vld [vmem:[%s952_s0 + $0x1ac] ss:$16 sps:$4 sm:$0xff]  }
   0xf   :  { %416 = vmatpush1.bf16.msra.mxu0 %v644_v14  ;;  %457 = vmatpush1.bf16.msra.mxu1 %v645_v15  ;;  %v686_v42 = vld [vmem:[%s952_s0 + $0x1a0] ss:$16 sps:$4 sm:$0xff]   ;;  %v687_v43 = vld [vmem:[%s952_s0 + $0x1a8] ss:$16 sps:$4 sm:$0xff]   ;;  %v688_v44 = vld [vmem:[%s952_s0 + $0x184] ss:$16 sps:$4 sm:$0xff]  }
  0x10   :  { %417 = vmatprep.subr.bf16.mxu0 %v646_v16  ;;  %458 = vmatprep.subr.bf16.mxu1 %v648_v17  ;;  %v690_v45 = vld [vmem:[%s952_s0 + $0x18c] ss:$16 sps:$4 sm:$0xff]   ;;  %v17_v46 = vld [vmem:[%s953_s1] sm:$0xff]  ;;  %v693_v49 = vld [vmem:[%s952_s0 + $0x188] ss:$16 sps:$4 sm:$0xff]   ;;  %v722_v3 = vmov 0  }
  0x11   :  { %v554_v47 = vcombine.high %v17_v46, %v17_v46  ;;  %v692_v48 = vld [vmem:[%s952_s0 + $0x180] ss:$16 sps:$4 sm:$0xff]   ;;  %v694_v50 = vld [vmem:[%s952_s0 + $0x164] ss:$16 sps:$4 sm:$0xff]   ;;  %v696_v51 = vld [vmem:[%s952_s0 + $0x16c] ss:$16 sps:$4 sm:$0xff]   ;;  %v553_v2 = vcombine.low %v17_v46, %v17_v46  ;;  %620 = vset.pattern.permute.xlu1 %v722_v3  ;;  %621 = vset.pattern.permute.xlu0 %v722_v3 }
  0x12   :  { %v698_v52 = vld [vmem:[%s952_s0 + $0x160] ss:$16 sps:$4 sm:$0xff]   ;;  %v699_v53 = vld [vmem:[%s952_s0 + $0x168] ss:$16 sps:$4 sm:$0xff]   ;;  %v700_v54 = vld [vmem:[%s952_s0 + $0x144] ss:$16 sps:$4 sm:$0xff]  }
  0x13   :  { %418 = vmatpush1.bf16.msra.mxu0 %v650_v18  ;;  %459 = vmatpush1.bf16.msra.mxu1 %v651_v19  ;;  %v702_v55 = vld [vmem:[%s952_s0 + $0x14c] ss:$16 sps:$4 sm:$0xff]   ;;  %v704_v56 = vld [vmem:[%s952_s0 + $0x140] ss:$16 sps:$4 sm:$0xff]   ;;  %v705_v57 = vld [vmem:[%s952_s0 + $0x148] ss:$16 sps:$4 sm:$0xff]  }
  0x14   :  { %419 = vmatprep.subr.bf16.mxu0 %v652_v20  ;;  %460 = vmatprep.subr.bf16.mxu1 %v654_v21  ;;  %v706_v58 = vld [vmem:[%s952_s0 + $0x124] ss:$16 sps:$4 sm:$0xff]   ;;  %v708_v59 = vld [vmem:[%s952_s0 + $0x12c] ss:$16 sps:$4 sm:$0xff]   ;;  %v710_v60 = vld [vmem:[%s952_s0 + $0x120] ss:$16 sps:$4 sm:$0xff]  }
  0x15   :  { %441 = vmatprep.mubr.bf16.mxu0 %v554_v47  ;;  %482 = vmatprep.mubr.bf16.mxu1 %v554_v47  ;;  %v711_v61 = vld [vmem:[%s952_s0 + $0x128] ss:$16 sps:$4 sm:$0xff]   ;;  %v712_v62 = vld [vmem:[%s952_s0 + $0x104] ss:$16 sps:$4 sm:$0xff]   ;;  %v714_v63 = vld [vmem:[%s952_s0 + $0x10c] ss:$16 sps:$4 sm:$0xff]  }
  0x16   :  { %v716_v0 = vld [vmem:[%s952_s0 + $0x100] ss:$16 sps:$4 sm:$0xff]   ;;  %v717_v1 = vld [vmem:[%s952_s0 + $0x108] ss:$16 sps:$4 sm:$0xff]  }
  0x17   :  { %420 = vmatpush1.bf16.msra.mxu0 %v656_v22  ;;  %461 = vmatpush1.bf16.msra.mxu1 %v657_v23  ;;  %v521_v4 = vld [vmem:[%s954_s2] sm:$0xff] }
  0x18   :  { %421 = vmatprep.subr.bf16.mxu0 %v658_v24  ;;  %462 = vmatprep.subr.bf16.mxu1 %v660_v25  ;;  %v531_v5 = vld [vmem:[%s955_s3] sm:$0xff] }
  0x19   :  { %524 = vperm.xlu1 %620, %v521_v4  }
  0x1b   :  { %422 = vmatpush1.bf16.msra.mxu0 %v662_v26  ;;  %463 = vmatpush1.bf16.msra.mxu1 %v663_v27 }
  0x1c   :  { %423 = vmatprep.subr.bf16.mxu0 %v664_v28  ;;  %464 = vmatprep.subr.bf16.mxu1 %v666_v29 }
  0x1d   :  { %534 = vperm.xlu1 %620, %v531_v5  }
  0x1f   :  { %424 = vmatpush1.bf16.msra.mxu0 %v668_v30  ;;  %465 = vmatpush1.bf16.msra.mxu1 %v669_v31 }
  0x20   :  { %425 = vmatprep.subr.bf16.mxu0 %v670_v32  ;;  %466 = vmatprep.subr.bf16.mxu1 %v672_v33 }
  0x23   :  { %426 = vmatpush2.bf16.msra.mxu0 %v674_v34  ;;  %467 = vmatpush2.bf16.msra.mxu1 %v675_v35 }
  0x24   :  { %427 = vmatprep.subr.bf16.mxu0 %v676_v36  ;;  %468 = vmatprep.subr.bf16.mxu1 %v678_v37 }
  0x27   :  { %428 = vmatpush2.bf16.msra.mxu0 %v680_v38  ;;  %469 = vmatpush2.bf16.msra.mxu1 %v681_v39 }
  0x28   :  { %429 = vmatprep.subr.bf16.mxu0 %v682_v40  ;;  %470 = vmatprep.subr.bf16.mxu1 %v684_v41 }
  0x2b   :  { %430 = vmatpush2.bf16.msra.mxu0 %v686_v42  ;;  %471 = vmatpush2.bf16.msra.mxu1 %v687_v43 }
  0x2c   :  { %431 = vmatprep.subr.bf16.mxu0 %v688_v44  ;;  %472 = vmatprep.subr.bf16.mxu1 %v690_v45 }
  0x2f   :  { %432 = vmatpush2.bf16.msra.mxu0 %v692_v48  ;;  %473 = vmatpush2.bf16.msra.mxu1 %v693_v49 }
  0x30   :  { %433 = vmatprep.subr.bf16.mxu0 %v694_v50  ;;  %474 = vmatprep.subr.bf16.mxu1 %v696_v51 }
  0x33   :  { %434 = vmatpush2.bf16.msra.mxu0 %v698_v52  ;;  %475 = vmatpush2.bf16.msra.mxu1 %v699_v53 }
  0x34   :  { %435 = vmatprep.subr.bf16.mxu0 %v700_v54  ;;  %476 = vmatprep.subr.bf16.mxu1 %v702_v55 }
  0x37   :  { %436 = vmatpush2.bf16.msra.mxu0 %v704_v56  ;;  %477 = vmatpush2.bf16.msra.mxu1 %v705_v57 }
  0x38   :  { %437 = vmatprep.subr.bf16.mxu0 %v706_v58  ;;  %478 = vmatprep.subr.bf16.mxu1 %v708_v59 }
  0x3b   :  { %438 = vmatpush2.bf16.msra.mxu0 %v710_v60  ;;  %479 = vmatpush2.bf16.msra.mxu1 %v711_v61 }
  0x3c   :  { %439 = vmatprep.subr.bf16.mxu0 %v712_v62  ;;  %480 = vmatprep.subr.bf16.mxu1 %v714_v63 }
  0x3f   :  { %440 = vmatpush2.bf16.msra.mxu0 %v716_v0  ;;  %481 = vmatpush2.bf16.msra.mxu1 %v717_v1 }
  0x42   :  { %442 = vmatmul.mubr.bf16.vlgmr.msra.gmra.mxu0 %v553_v2  ;;  %483 = vmatmul.mubr.bf16.vlgmr.msra.gmra.mxu1 %v553_v2 }
  0x94   :  { %v525_v32 = vpop.permute.xlu1 %524 }
  0x98   :  { %v535_v46 = vpop.permute.xlu1 %534 }
 0x102   :  { %v443_v6 = vpop.f32.mrf.mxu0  ;;  %v484_v7 = vpop.f32.mrf.mxu1 }
 0x103   :  { %v498_v10 = vmul.f32 %v443_v6, %v443_v6  ;;  %v500_v11 = vmul.f32 %v484_v7, %v484_v7 }
 0x104   :  { %v445_v8 = vpop.f32.mrf.mxu0  ;;  %v486_v9 = vpop.f32.mrf.mxu1 }
 0x105   :  { %v491_v12 = vadd.f32 %v445_v8, %v443_v6  ;;  %v499_v13 = vmul.f32 %v445_v8, %v445_v8  ;;  %v501_v22 = vmul.f32 %v486_v9, %v486_v9 }
 0x106   :  { %v447_v14 = vpop.f32.mrf.mxu0  ;;  %v488_v15 = vpop.f32.mrf.mxu1 }
 0x107   :  { %v492_v16 = vadd.f32 %v491_v12, %v484_v7  ;;  %v502_v17 = vadd.f32 %v499_v13, %v498_v10 }
 0x108   :  { %v448_v18 = vpop.f32.mrf.mxu0  ;;  %v489_v19 = vpop.f32.mrf.mxu1 }
 0x109   :  { %v493_v20 = vadd.f32 %v492_v16, %v486_v9  ;;  %v503_v21 = vadd.f32 %v502_v17, %v500_v11 }
 0x10b   :  { %494 = vadd.xlane.f32.xlu0 %v493_v20  ;;  %v504_v23 = vadd.f32 %v503_v21, %v501_v22 }
 0x10f   :  { %505 = vadd.xlane.f32.xlu0 %v504_v23 }
 0x194   :  { %v495_v24 = vpop.xlane.xlu0 %494 }
 0x195   :  { %v497_v25 = vmul.f32 0.001953125, %v495_v24 }
 0x197   :  { %v508_v27 = vmul.f32 %v497_v25, %v497_v25  ;;  %v511_v33 = vsub.f32 %v443_v6, %v497_v25  ;;  %v512_v34 = vsub.f32 %v445_v8, %v497_v25  ;;  %v513_v35 = vsub.f32 %v484_v7, %v497_v25 }
 0x198   :  { %v506_v26 = vpop.xlane.xlu0 %505  ;;  %v514_v36 = vsub.f32 %v486_v9, %v497_v25 }
 0x199   :  { %v507_v28 = vmul.f32 0.001953125, %v506_v26 }
 0x19b   :  { %v509_v29 = vsub.f32 %v507_v28, %v508_v27 }
 0x19d   :  { %v510_v30 = vmax.f32 %v509_v29, 0.0 }
 0x19f   :  { %v515_v31 = vadd.f32 1e-05, %v510_v30 }
 0x1a1   :  { %720 = vrsqrt.f32 %v515_v31 }
 0x1ae   :  { %v721_v37 = vpop.eup %720 }
 0x1af   :  { %v517_v38 = vmul.f32 %v721_v37, %v511_v33  ;;  %v518_v39 = vmul.f32 %v721_v37, %v512_v34  ;;  %v519_v40 = vmul.f32 %v721_v37, %v513_v35  ;;  %v520_v41 = vmul.f32 %v721_v37, %v514_v36 }
 0x1b1   :  { %v527_v42 = vmul.f32 %v525_v32, %v517_v38  ;;  %v528_v43 = vmul.f32 %v525_v32, %v518_v39  ;;  %v529_v44 = vmul.f32 %v525_v32, %v519_v40  ;;  %v530_v45 = vmul.f32 %v525_v32, %v520_v41 }
 0x1b3   :  { %v537_v47 = vadd.f32 %v535_v46, %v527_v42  ;;  %v538_v48 = vadd.f32 %v535_v46, %v528_v43  ;;  %v539_v49 = vadd.f32 %v535_v46, %v529_v44  ;;  %v540_v50 = vadd.f32 %v535_v46, %v530_v45 }
 0x1b5   :  { %v541_v51 = vmax.f32 %v537_v47, 0.0  ;;  %v542_v52 = vmax.f32 %v538_v48, 0.0  ;;  %v543_v53 = vmax.f32 %v539_v49, 0.0  ;;  %v544_v54 = vmax.f32 %v540_v50, 0.0 }
 0x1b7   :  { %v545_v55 = vmax.f32 %v541_v51, %v542_v52  ;;  %v546_v56 = vmax.f32 %v543_v53, %v544_v54 }
 0x1b9   :  { %v547_v57 = vmax.f32 %v545_v55, %v546_v56 }
 0x1bb   :  { %548 = vst [vmem:[%s956_s4] sm:$0xff] %v547_v57 }

// kernel: relation_network_forward.6
= control target key start
LH: loop header
LB: loop body
LE: loop exit
PB: predicated region body
PF: predicated region fallthrough
CT: control target
= control target key end

     0   :  { %v180_v0 = vmov 0.0   ;;  %vm181_vm0 = vmmov 0   ;;  %s235_s1 = inlined_call_operand.vmem [shape: bf16[128,128], index: 1, kind: input, shape index: {}]   ;;  %s236_s0 = inlined_call_operand.vmem [shape: bf16[8,128], index: 0, kind: input, shape index: {}]   ;;  %s237_s2 = inlined_call_operand.vmem [shape: f32[1,128], index: 2, kind: input, shape index: {}]   ;;  %s238_s3 = inlined_call_operand.vmem [shape: f32[8,128], index: 3, kind: output, shape index: {}]  }
   0x1   :  { %150 = vmatprep.subr.bf16.mxu0 %v180_v0  ;;  %v172_v1 = vld [vmem:[%s235_s1 + $0x38] sm:$0xff]   ;;  %166 = vmatprep.mubr.msk.bf16.mxu0 %vm181_vm0, %v180_v0  ;;  %v173_v2 = vld [vmem:[%s235_s1 + $0x30] sm:$0xff]   ;;  %v174_v3 = vld [vmem:[%s235_s1 + $0x28] sm:$0xff]  }
   0x2   :  { %151 = vmatpush3.bf16.msra.mxu0 %v172_v1  ;;  %v175_v4 = vld [vmem:[%s235_s1 + $0x20] sm:$0xff]   ;;  %v176_v5 = vld [vmem:[%s235_s1 + $0x18] sm:$0xff]   ;;  %v177_v6 = vld [vmem:[%s235_s1 + $0x10] sm:$0xff]  }
   0x3   :  { %152 = vmatprep.subr.bf16.mxu0 %v180_v0  ;;  %v178_v7 = vld [vmem:[%s235_s1 + $0x8] sm:$0xff]   ;;  %v179_v8 = vld [vmem:[%s235_s1] sm:$0xff]  }
   0x4   :  { %v15_v9 = vld [vmem:[%s236_s0] sm:$0xf] }
   0x5   :  { %v132_v10 = vld [vmem:[%s237_s2] ss:$0 sm:$0xff] }
   0x6   :  { %153 = vmatpush3.bf16.msra.mxu0 %v173_v2 }
   0x7   :  { %154 = vmatprep.subr.bf16.mxu0 %v180_v0 }
   0xa   :  { %155 = vmatpush3.bf16.msra.mxu0 %v174_v3 }
   0xb   :  { %156 = vmatprep.subr.bf16.mxu0 %v180_v0 }
   0xe   :  { %157 = vmatpush3.bf16.msra.mxu0 %v175_v4 }
   0xf   :  { %158 = vmatprep.subr.bf16.mxu0 %v180_v0 }
  0x12   :  { %159 = vmatpush3.bf16.msra.mxu0 %v176_v5 }
  0x13   :  { %160 = vmatprep.subr.bf16.mxu0 %v180_v0 }
  0x16   :  { %161 = vmatpush3.bf16.msra.mxu0 %v177_v6 }
  0x17   :  { %162 = vmatprep.subr.bf16.mxu0 %v180_v0 }
  0x1a   :  { %163 = vmatpush3.bf16.msra.mxu0 %v178_v7 }
  0x1b   :  { %164 = vmatprep.subr.bf16.mxu0 %v180_v0 }
  0x1e   :  { %165 = vmatpush3.bf16.msra.mxu0 %v179_v8 }
  0x21   :  { %167 = vmatmul.mubr.bf16.vlgmr.msra.gmra.mxu0 %v15_v9 }
  0xe1   :  { %v121_v11 = vpop.f32.mrf.mxu0 }
  0xe2   :  { %v122_v12 = vadd.f32 %v132_v10, %v121_v11 }
  0xe3   :  { %v168_v13 = vpop.f32.mrf.mxu0 }
  0xe4   :  { %127 = vst [vmem:[%s238_s3] sm:$0xff] %v122_v12 }
  0xe5   :  { %v124_v14 = vpop.f32.mrf.mxu0 }
  0xe7   :  { %v169_v15 = vpop.f32.mrf.mxu0 }

// kernel: sub.8
= control target key start
LH: loop header
LB: loop body
LE: loop exit
PB: predicated region body
PF: predicated region fallthrough
CT: control target
= control target key end

     0   :  { %vm8_vm0 = vcmask 31744   ;;  %s40_s8 = smov 4   ;;  %s41_s9 = smov 8   ;;  %vm14_vm1 = vcmask 130144   ;;  %vm20_vm2 = vcmask 97344   ;;  %vm26_vm3 = vcmask 64544   ;;  %s58_s0 = inlined_call_operand.vmem [shape: f32[4,4], index: 0, kind: input, shape index: {}]   ;;  %s59_s1 = inlined_call_operand.vmem [shape: f32[16], index: 1, kind: output, shape index: {}]  }
   0x1   :  { %v5_v0 = vld [vmem:[%s58_s0] sm:$0xf]  ;;  %s39_s0 = smov 12  }
   0x2   :  { %6 = vst [vmem:[#allocation1] sm:$0xf] %v5_v0 }
   0x9   :  { %v11_v1 = vld [vmem:[#allocation1 + $0x3] sm:$0x1]   ;;  %v23_v2 = vld [vmem:[#allocation1 + $0x1] sm:$0x1]   ;;  %v7_v3 = vld [vmem:[#allocation1] sm:$0x1]  }
   0xa   :  { %12 = vrot.lane.b32.xlu0 %v11_v1, %s39_s0  ;;  %24 = vrot.lane.b32.xlu1 %v23_v2, %s40_s8  ;;  %v17_v4 = vld [vmem:[#allocation1 + $0x2] sm:$0x1]   ;;  %9 = vst.msk [vmem:[#allocation0] sm:$0x1] %vm8_vm0, %v7_v3  }
   0xe   :  { %18 = vrot.lane.b32.xlu0 %v17_v4, %s41_s9 }
  0x7c   :  { %v13_v5 = vpop.permute.xlu0 %12   ;;  %v25_v6 = vpop.permute.xlu1 %24  }
  0x7d   :  { %15 = vst.msk [vmem:[#allocation0] sm:$0x1] %vm14_vm1, %v13_v5  }
  0x80   :  { %v19_v7 = vpop.permute.xlu0 %18  }
  0x81   :  { %21 = vst.msk [vmem:[#allocation0] sm:$0x1] %vm20_vm2, %v19_v7  }
  0x82   :  { %27 = vst.msk [vmem:[#allocation0] sm:$0x1] %vm26_vm3, %v25_v6  }
  0x89   :  { %v32_v8 = vld [vmem:[#allocation0] sm:$0x1] }
  0x8a   :  { %35 = vst [vmem:[%s59_s1] sm:$0x1] %v32_v8 }

// kernel: relation_network_forward.7
= control target key start
LH: loop header
LB: loop body
LE: loop exit
PB: predicated region body
PF: predicated region fallthrough
CT: control target
= control target key end

     0   :  { %v489_v0 = vmov 0.0   ;;  %vm490_vm0 = vmmov 0   ;;  %v241_v21 = vlaneseq  ;;  %v491_v25 = vmov 1966171168   ;;  %s596_s2 = inlined_call_operand.vmem [shape: bf16[128,32], index: 2, kind: input, shape index: {}]   ;;  %s597_s3 = inlined_call_operand.vmem [shape: bf16[128,32], index: 3, kind: input, shape index: {}]   ;;  %s598_s0 = inlined_call_operand.vmem [shape: f32[4,128], index: 0, kind: input, shape index: {}]   ;;  %s599_s1 = inlined_call_operand.vmem [shape: f32[4,128], index: 1, kind: input, shape index: {}]   ;;  %s600_s4 = inlined_call_operand.vmem [shape: f32[1,32], index: 4, kind: input, shape index: {}]   ;;  %s601_s5 = inlined_call_operand.<no memory space> [shape: f32[1,1], index: 5, kind: input, shape index: {}]   ;;  %s602_s6 = inlined_call_operand.vmem [shape: f32[4,4], index: 6, kind: output, shape index: {}]  }
   0x1   :  { %414 = vmatprep.subr.bf16.mxu0 %v489_v0  ;;  %434 = vmatprep.subr.bf16.mxu1 %v489_v0  ;;  %v457_v1 = vld [vmem:[%s596_s2 + $0x38] sm:$0xff]   ;;  %v459_v3 = vld [vmem:[%s596_s2 + $0x30] sm:$0xff]   ;;  %v461_v5 = vld [vmem:[%s596_s2 + $0x28] sm:$0xff]   ;;  %v239_v26 = vunpack.c.l.s4 %v491_v25  ;;  %vm301_vm1 = vcmask 257024   ;;  %vm366_vm2 = vcmask 1041409   ;;  %vm368_vm3 = vcmask 1042434  }
   0x2   :  { %v458_v2 = vld [vmem:[%s597_s3 + $0x38] sm:$0xff]   ;;  %430 = vmatprep.mubr.msk.bf16.mxu0 %vm490_vm0, %v489_v0  ;;  %450 = vmatprep.mubr.msk.bf16.mxu1 %vm490_vm0, %v489_v0  ;;  %v460_v4 = vld [vmem:[%s597_s3 + $0x30] sm:$0xff]   ;;  %v462_v6 = vld [vmem:[%s597_s3 + $0x28] sm:$0xff]   ;;  %v242_v22 = vshrl.u32 %v241_v21, 7  ;;  %v349_v23 = vand.u32 127, %v241_v21  ;;  %vm370_vm4 = vcmask 1043459  }
   0x3   :  { %415 = vmatpush3.bf16.msra.mxu0 %v457_v1  ;;  %435 = vmatpush3.bf16.msra.mxu1 %v458_v2  ;;  %v463_v7 = vld [vmem:[%s596_s2 + $0x20] sm:$0xff]   ;;  %v465_v9 = vld [vmem:[%s596_s2 + $0x18] sm:$0xff]   ;;  %v467_v11 = vld [vmem:[%s596_s2 + $0x10] sm:$0xff]   ;;  %v240_v27 = vunpack.c.0.s8 %v239_v26  ;;  %v315_v1 = vstv %s601_s5  ;;  %vm373_vm5 = vcmask 27648  }
   0x4   :  { %416 = vmatprep.subr.bf16.mxu0 %v489_v0  ;;  %436 = vmatprep.subr.bf16.mxu1 %v489_v0  ;;  %v464_v8 = vld [vmem:[%s597_s3 + $0x20] sm:$0xff]   ;;  %v466_v10 = vld [vmem:[%s597_s3 + $0x18] sm:$0xff]   ;;  %v468_v12 = vld [vmem:[%s597_s3 + $0x10] sm:$0xff]   ;;  %v581_v24 = vsub.s32 %v349_v23, %v242_v22  ;;  %v264_v31 = vsub.s32 0, %v242_v22 }
   0x5   :  { %v469_v13 = vld [vmem:[%s596_s2 + $0x8] sm:$0xff]   ;;  %v471_v15 = vld [vmem:[%s596_s2] sm:$0xff]   ;;  %v243_v28 = vsub.s32 %v240_v27, %v242_v22 }
   0x6   :  { %v470_v14 = vld [vmem:[%s597_s3 + $0x8] sm:$0xff]   ;;  %v25_v16 = vld [vmem:[%s598_s0] sm:$0xf] }
   0x7   :  { %417 = vmatpush3.bf16.msra.mxu0 %v459_v3  ;;  %437 = vmatpush3.bf16.msra.mxu1 %v460_v4  ;;  %v472_v17 = vld [vmem:[%s597_s3] sm:$0xff]   ;;  %v26_v19 = vpack.c.bf16 %v25_v16, %v25_v16 }
   0x8   :  { %418 = vmatprep.subr.bf16.mxu0 %v489_v0  ;;  %438 = vmatprep.subr.bf16.mxu1 %v489_v0  ;;  %v131_v18 = vld [vmem:[%s599_s1] sm:$0xf] }
   0x9   :  { %v132_v20 = vpack.c.bf16 %v131_v18, %v131_v18  ;;  %v395_v48 = vld [vmem:[%s600_s4] ss:$0 sm:$0xff] }
   0xb   :  { %419 = vmatpush3.bf16.msra.mxu0 %v461_v5  ;;  %439 = vmatpush3.bf16.msra.mxu1 %v462_v6 }
   0xc   :  { %420 = vmatprep.subr.bf16.mxu0 %v489_v0  ;;  %440 = vmatprep.subr.bf16.mxu1 %v489_v0 }
   0xf   :  { %421 = vmatpush3.bf16.msra.mxu0 %v463_v7  ;;  %441 = vmatpush3.bf16.msra.mxu1 %v464_v8 }
  0x10   :  { %422 = vmatprep.subr.bf16.mxu0 %v489_v0  ;;  %442 = vmatprep.subr.bf16.mxu1 %v489_v0 }
  0x13   :  { %423 = vmatpush3.bf16.msra.mxu0 %v465_v9  ;;  %443 = vmatpush3.bf16.msra.mxu1 %v466_v10 }
  0x14   :  { %424 = vmatprep.subr.bf16.mxu0 %v489_v0  ;;  %444 = vmatprep.subr.bf16.mxu1 %v489_v0 }
  0x17   :  { %425 = vmatpush3.bf16.msra.mxu0 %v467_v11  ;;  %445 = vmatpush3.bf16.msra.mxu1 %v468_v12 }
  0x18   :  { %426 = vmatprep.subr.bf16.mxu0 %v489_v0  ;;  %446 = vmatprep.subr.bf16.mxu1 %v489_v0 }
  0x1b   :  { %427 = vmatpush3.bf16.msra.mxu0 %v469_v13  ;;  %447 = vmatpush3.bf16.msra.mxu1 %v470_v14 }
  0x1c   :  { %428 = vmatprep.subr.bf16.mxu0 %v489_v0  ;;  %448 = vmatprep.subr.bf16.mxu1 %v489_v0 }
  0x1f   :  { %429 = vmatpush3.bf16.msra.mxu0 %v471_v15  ;;  %449 = vmatpush3.bf16.msra.mxu1 %v472_v17 }
  0x22   :  { %431 = vmatmul.mubr.bf16.vlgmr.msra.gmra.mxu0 %v26_v19  ;;  %451 = vmatmul.mubr.bf16.vlgmr.msra.gmra.mxu1 %v132_v20 }
  0xe2   :  { %v125_v29 = vpop.f32.mrf.mxu0  ;;  %v231_v32 = vpop.f32.mrf.mxu1 }
  0xe3   :  { %v244_v30 = vrot.slane %v125_v29, %v243_v28 }
  0xe4   :  { %v432_v33 = vpop.f32.mrf.mxu0  ;;  %v452_v36 = vpop.f32.mrf.mxu1 }
  0xe5   :  { %v245_v34 = vcombine.high %v244_v30, %v244_v30  ;;  %v252_v35 = vrot.slane %v244_v30, %v243_v28 }
  0xe6   :  { %v128_v37 = vpop.f32.mrf.mxu0  ;;  %v234_v41 = vpop.f32.mrf.mxu1 }
  0xe7   :  { %v259_v38 = vrot.slane %v245_v34, %v243_v28  ;;  %v260_v39 = vcombine.high %v252_v35, %v252_v35  ;;  %v265_v40 = vrot.slane %v252_v35, %v264_v31 }
  0xe8   :  { %v433_v42 = vpop.f32.mrf.mxu0  ;;  %v453_v45 = vpop.f32.mrf.mxu1 }
  0xe9   :  { %v261_v43 = vcombine.high %v259_v38, %v259_v38  ;;  %v269_v44 = vrot.slane %v259_v38, %v264_v31  ;;  %v282_v46 = vadd.f32 %v265_v40, %v231_v32  ;;  %v273_v47 = vrot.slane %v260_v39, %v264_v31 }
  0xeb   :  { %v286_v49 = vmax.f32 %v282_v46, 0.0  ;;  %v284_v50 = vadd.f32 %v273_v47, %v231_v32  ;;  %v283_v51 = vadd.f32 %v269_v44, %v231_v32  ;;  %v277_v52 = vrot.slane %v261_v43, %v264_v31 }
  0xed   :  { %v297_v53 = vmul.f32 %v395_v48, %v286_v49  ;;  %v288_v54 = vmax.f32 %v284_v50, 0.0  ;;  %v287_v55 = vmax.f32 %v283_v51, 0.0  ;;  %v285_v56 = vadd.f32 %v277_v52, %v231_v32 }
  0xef   :  { %v302_v57 = vsel %vm301_vm1, %v297_v53, 0.0  ;;  %v299_v58 = vmul.f32 %v395_v48, %v288_v54  ;;  %v298_v59 = vmul.f32 %v395_v48, %v287_v55  ;;  %v289_v60 = vmax.f32 %v285_v56, 0.0 }
  0xf0   :  { %303 = vadd.xlane.f32.xlu0 %v302_v57 }
  0xf1   :  { %v308_v61 = vsel %vm301_vm1, %v299_v58, 0.0  ;;  %v300_v62 = vmul.f32 %v395_v48, %v289_v60  ;;  %v305_v63 = vsel %vm301_vm1, %v298_v59, 0.0 }
  0xf2   :  { %309 = vadd.xlane.f32.xlu1 %v308_v61 }
  0xf3   :  { %v311_v0 = vsel %vm301_vm1, %v300_v62, 0.0 }
  0xf4   :  { %306 = vadd.xlane.f32.xlu0 %v305_v63 }
  0xf6   :  { %312 = vadd.xlane.f32.xlu1 %v311_v0 }
 0x179   :  { %v304_v2 = vpop.xlane.xlu0 %303 }
 0x17a   :  { %v316_v3 = vadd.f32 %v315_v1, %v304_v2 }
 0x17b   :  { %v310_v4 = vpop.xlane.xlu1 %309 }
 0x17c   :  { %v320_v5 = vsub.f32 0.0, %v316_v3  ;;  %v318_v6 = vadd.f32 %v315_v1, %v310_v4 }
 0x17d   :  { %v307_v7 = vpop.xlane.xlu0 %306 }
 0x17e   :  { %v324_v8 = vmul.f32 1.442695, %v320_v5  ;;  %v322_v9 = vsub.f32 0.0, %v318_v6  ;;  %v317_v10 = vadd.f32 %v315_v1, %v307_v7 }
 0x17f   :  { %v313_v11 = vpop.xlane.xlu1 %312 }
 0x180   :  { %473 = vpow2.f32 %v324_v8  ;;  %v328_v12 = vmul.f32 1.442695, %v322_v9  ;;  %v321_v13 = vsub.f32 0.0, %v317_v10  ;;  %v319_v14 = vadd.f32 %v315_v1, %v313_v11 }
 0x182   :  { %475 = vpow2.f32 %v328_v12  ;;  %v326_v15 = vmul.f32 1.442695, %v321_v13  ;;  %v323_v16 = vsub.f32 0.0, %v319_v14 }
 0x184   :  { %477 = vpow2.f32 %v326_v15  ;;  %v330_v17 = vmul.f32 1.442695, %v323_v16 }
 0x186   :  { %479 = vpow2.f32 %v330_v17 }
 0x18d   :  { %v474_v18 = vpop.eup %473 }
 0x18e   :  { %v332_v19 = vadd.f32 1.0, %v474_v18 }
 0x18f   :  { %v476_v20 = vpop.eup %475 }
 0x190   :  { %v334_v21 = vadd.f32 1.0, %v476_v20  ;;  %481 = vrcp.f32 %v332_v19 }
 0x191   :  { %v478_v22 = vpop.eup %477 }
 0x192   :  { %v333_v23 = vadd.f32 1.0, %v478_v22  ;;  %483 = vrcp.f32 %v334_v21 }
 0x193   :  { %v480_v25 = vpop.eup %479 }
 0x194   :  { %485 = vrcp.f32 %v333_v23  ;;  %v335_v26 = vadd.f32 1.0, %v480_v25 }
 0x196   :  { %487 = vrcp.f32 %v335_v26 }
 0x19d   :  { %v482_v27 = vpop.eup %481 }
 0x19e   :  { %v353_v30 = vrot.slane %v482_v27, %v581_v24 }
 0x19f   :  { %v484_v28 = vpop.eup %483 }
 0x1a0   :  { %v361_v33 = vrot.slane %v484_v28, %v581_v24 }
 0x1a1   :  { %v486_v29 = vpop.eup %485 }
 0x1a2   :  { %v357_v31 = vrot.slane %v486_v29, %v581_v24 }
 0x1a3   :  { %v488_v32 = vpop.eup %487 }
 0x1a4   :  { %v367_v34 = vsel %vm366_vm2, %v357_v31, %v353_v30  ;;  %v365_v35 = vrot.slane %v488_v32, %v581_v24 }
 0x1a5   :  { %v369_v36 = vsel %vm368_vm3, %v361_v33, %v367_v34 }
 0x1a6   :  { %v371_v37 = vsel %vm370_vm4, %v365_v35, %v369_v36 }
 0x1a7   :  { %374 = vst.msk [vmem:[%s602_s6] sm:$0xf] %vm373_vm5, %v371_v37 }

</bundles_post_ra>
